<compile_context>
chip_gen: v7x
topology: tpu7x:2x2x1
jax: 0.10.0
libtpu: 0.0.40
codegen_flags: <defaults>
</compile_context>

<pallas_src>
import functools
import math

import jax
import jax.numpy as jnp
from jax.experimental import pallas as pl
from jax.experimental.pallas import tpu as pltpu

_EPS = 1e-5  # torch LayerNorm default


# ----------------------------------------------------------------------------
# Hardware-aware budgets (v7x has 64 MiB VMEM, v5e/v6e have 128 MiB)
# ----------------------------------------------------------------------------
def _vmem_capacity_bytes():
    default = 64 * 1024 * 1024
    try:
        fn = getattr(pltpu, "get_tpu_info", None)
        if fn is None:
            return default
        return int(getattr(fn(), "vmem_capacity_bytes", default))
    except Exception:
        return default


_VMEM_CAP = _vmem_capacity_bytes()
_BIG_VMEM = _VMEM_CAP >= 100 * 1024 * 1024            # v5e / v6e
_VMEM_LIMIT = min(int(_VMEM_CAP * 3 // 4), 96 * 1024 * 1024)

_CAP_M = 512 if _BIG_VMEM else 256                     # row tile cap
_CAP_N = 1024 if _BIG_VMEM else 512                    # matmul output-col tile cap
_CAP_K = 1024 if _BIG_VMEM else 512                    # matmul contraction tile cap
_CAP_K_LN = 512 if _BIG_VMEM else 256                  # res+LN kernel keeps full-N blocks resident
_CAP_F = 2048 if _BIG_VMEM else 1024                   # FFN hidden-dim chunk


def _pick_row_tile(M, cap):
    """Largest multiple-of-8 divisor of M <= cap, aiming for >= 2 row blocks
    (keeps both v7x TensorCores busy); falls back to the full dim."""
    target = min(cap, max(8, M // 2))
    best = 0
    d = 8
    while d <= target:
        if M % d == 0:
            best = d
        d += 8
    return best if best > 0 else M


def _pick_lane_tile(D, cap):
    """Largest multiple-of-128 divisor of D <= cap, else the full dim."""
    best = 0
    d = 128
    while d <= min(cap, D):
        if D % d == 0:
            best = d
        d += 128
    return best if best > 0 else D


# ----------------------------------------------------------------------------
# Pallas kernels
# ----------------------------------------------------------------------------
def _matmul_kernel(x_ref, w_ref, b_ref, o_ref, acc_ref):
    # Tiled y = x @ w + b.  bf16 MXU inputs, f32 accumulator, bf16 output.
    @pl.when(pl.program_id(2) == 0)
    def _init():
        acc_ref[...] = jnp.zeros_like(acc_ref)

    acc_ref[...] += jnp.dot(x_ref[...], w_ref[...],
                            preferred_element_type=jnp.float32)

    @pl.when(pl.program_id(2) == pl.num_programs(2) - 1)
    def _fin():
        o_ref[...] = (acc_ref[...] + b_ref[...]).astype(o_ref.dtype)


def _matmul_res_ln_kernel(x_ref, w_ref, b_ref, res_ref, g_ref, beta_ref,
                          o_ref, acc_ref, *, eps):
    # Tiled y = LayerNorm(res + x @ w + b): residual-add + LN fused into the epilogue.
    @pl.when(pl.program_id(1) == 0)
    def _init():
        acc_ref[...] = jnp.zeros_like(acc_ref)

    acc_ref[...] += jnp.dot(x_ref[...], w_ref[...],
                            preferred_element_type=jnp.float32)

    @pl.when(pl.program_id(1) == pl.num_programs(1) - 1)
    def _fin():
        z = acc_ref[...] + b_ref[...] + res_ref[...].astype(jnp.float32)
        mu = jnp.mean(z, axis=-1, keepdims=True)
        var = jnp.mean((z - mu) * (z - mu), axis=-1, keepdims=True)
        o_ref[...] = ((z - mu) * jax.lax.rsqrt(var + eps) * g_ref[...]
                      + beta_ref[...]).astype(o_ref.dtype)


def _ffn_kernel(x_ref, w1_ref, b1_ref, w2_ref, b2_ref, g_ref, beta_ref,
                o_ref, acc_ref, *, eps):
    # Fused FFN tiled over the hidden dim F:
    #   acc += relu(x @ w1[:, f] + b1[f]) @ w2[f, :], LayerNorm(x + acc + b2) in the last step.
    # The (tm, tf) intermediate stays in VMEM/vregs; x doubles as the residual.
    f = pl.program_id(1)

    @pl.when(f == 0)
    def _init():
        acc_ref[...] = jnp.zeros_like(acc_ref)

    h = jnp.dot(x_ref[...], w1_ref[...], preferred_element_type=jnp.float32) + b1_ref[...]
    h = jnp.maximum(h, 0.0)
    acc_ref[...] += jnp.dot(h.astype(jnp.bfloat16), w2_ref[...],
                            preferred_element_type=jnp.float32)

    @pl.when(f == pl.num_programs(1) - 1)
    def _fin():
        z = acc_ref[...] + b2_ref[...] + x_ref[...].astype(jnp.float32)
        mu = jnp.mean(z, axis=-1, keepdims=True)
        var = jnp.mean((z - mu) * (z - mu), axis=-1, keepdims=True)
        o_ref[...] = ((z - mu) * jax.lax.rsqrt(var + eps) * g_ref[...]
                      + beta_ref[...]).astype(o_ref.dtype)


def _sdpa_kernel(q_ref, k_ref, v_ref, o_ref, *, nhead, scale):
    # Multi-head SDPA for a slab of batch elements.  q/k/v arrive in (tb, L, E) layout
    # straight from the QKV projection (no wrapper transposes); heads are static lane
    # slices of width dh.  Matmuls use bf16 MXU inputs with f32 accumulation; softmax
    # (max/exp/sum/reciprocal) stays in f32; scale is applied to the f32 accumulator.
    q = q_ref[...]              # (tb, Lq, E) bf16
    k = k_ref[...]              # (tb, Lk, E) bf16
    v = v_ref[...]
    E = q.shape[-1]
    dh = E // nhead
    outs = []
    for h in range(nhead):      # static unrolled loop over heads
        sl = slice(h * dh, (h + 1) * dh)
        s = jnp.einsum("bqd,bkd->bqk", q[..., sl], k[..., sl],
                       preferred_element_type=jnp.float32) * scale
        m = jnp.max(s, axis=-1, keepdims=True)
        p = jnp.exp(s - m)
        p = p * pl.reciprocal(jnp.sum(p, axis=-1, keepdims=True), approx=True)
        outs.append(jnp.einsum("bqk,bkd->bqd", p.astype(v.dtype), v[..., sl],
                               preferred_element_type=jnp.float32))
    o_ref[...] = jnp.concatenate(outs, axis=-1).astype(o_ref.dtype)


# ----------------------------------------------------------------------------
# Pallas wrappers
# ----------------------------------------------------------------------------
def pallas_linear(x, w, b):
    """y = x @ w + b.  x/w bf16, b f32, output bf16."""
    M, K = x.shape
    N = w.shape[1]
    tm = _pick_row_tile(M, _CAP_M)
    tn = _pick_lane_tile(N, _CAP_N)
    tk = _pick_lane_tile(K, _CAP_K)
    return pl.pallas_call(
        _matmul_kernel,
        out_shape=jax.ShapeDtypeStruct((M, N), jnp.bfloat16),
        grid=(M // tm, N // tn, K // tk),
        in_specs=[
            pl.BlockSpec((tm, tk), lambda i, j, kk: (i, kk)),
            pl.BlockSpec((tk, tn), lambda i, j, kk: (kk, j)),
            pl.BlockSpec((1, tn), lambda i, j, kk: (0, j)),
        ],
        out_specs=pl.BlockSpec((tm, tn), lambda i, j, kk: (i, j)),
        scratch_shapes=[pltpu.VMEM((tm, tn), jnp.float32)],
        compiler_params=pltpu.CompilerParams(
            dimension_semantics=("parallel", "parallel", "arbitrary"),
            vmem_limit_bytes=_VMEM_LIMIT),
    )(x, w, b.reshape(1, N))


def pallas_linear_res_ln(x, w, b, res, gamma, beta, eps=_EPS):
    """y = LayerNorm(res + x @ w + b).  Full output row per tile (LN over last dim)."""
    M, K = x.shape
    N = w.shape[1]
    tm = _pick_row_tile(M, _CAP_M)
    tk = _pick_lane_tile(K, _CAP_K_LN)
    return pl.pallas_call(
        functools.partial(_matmul_res_ln_kernel, eps=eps),
        out_shape=jax.ShapeDtypeStruct((M, N), jnp.bfloat16),
        grid=(M // tm, K // tk),
        in_specs=[
            pl.BlockSpec((tm, tk), lambda i, kk: (i, kk)),
            pl.BlockSpec((tk, N), lambda i, kk: (kk, 0)),
            pl.BlockSpec((1, N), lambda i, kk: (0, 0)),
            pl.BlockSpec((tm, N), lambda i, kk: (i, 0)),
            pl.BlockSpec((1, N), lambda i, kk: (0, 0)),
            pl.BlockSpec((1, N), lambda i, kk: (0, 0)),
        ],
        out_specs=pl.BlockSpec((tm, N), lambda i, kk: (i, 0)),
        scratch_shapes=[pltpu.VMEM((tm, N), jnp.float32)],
        compiler_params=pltpu.CompilerParams(
            dimension_semantics=("parallel", "arbitrary"),
            vmem_limit_bytes=_VMEM_LIMIT),
    )(x, w, b.reshape(1, N), res, gamma.reshape(1, N), beta.reshape(1, N))


def pallas_ffn(x, w1, b1, w2, b2, gamma, beta, eps=_EPS):
    """y = LayerNorm(x + relu(x @ w1 + b1) @ w2 + b2), fused, tiled over the hidden dim."""
    M, E = x.shape
    F = w1.shape[1]
    tm = _pick_row_tile(M, _CAP_M)
    tf = _pick_lane_tile(F, _CAP_F)
    return pl.pallas_call(
        functools.partial(_ffn_kernel, eps=eps),
        out_shape=jax.ShapeDtypeStruct((M, E), jnp.bfloat16),
        grid=(M // tm, F // tf),
        in_specs=[
            pl.BlockSpec((tm, E), lambda i, f: (i, 0)),
            pl.BlockSpec((E, tf), lambda i, f: (0, f)),
            pl.BlockSpec((1, tf), lambda i, f: (0, f)),
            pl.BlockSpec((tf, E), lambda i, f: (f, 0)),
            pl.BlockSpec((1, E), lambda i, f: (0, 0)),
            pl.BlockSpec((1, E), lambda i, f: (0, 0)),
            pl.BlockSpec((1, E), lambda i, f: (0, 0)),
        ],
        out_specs=pl.BlockSpec((tm, E), lambda i, f: (i, 0)),
        scratch_shapes=[pltpu.VMEM((tm, E), jnp.float32)],
        compiler_params=pltpu.CompilerParams(
            dimension_semantics=("parallel", "arbitrary"),
            vmem_limit_bytes=_VMEM_LIMIT),
    )(x, w1, b1.reshape(1, F), w2, b2.reshape(1, E),
      gamma.reshape(1, E), beta.reshape(1, E))


def pallas_sdpa(q, k, v, nhead):
    """Multi-head SDPA.  q: (N, Lq, E), k/v: (N, Lk, E) bf16 (batch-first), out (N, Lq, E) bf16."""
    N, Lq, E = q.shape
    Lk = k.shape[1]
    dh = E // nhead
    scale = 1.0 / math.sqrt(dh)
    # Per-batch-element VMEM footprint: bf16 q/k/v/o tiles + one head's f32 score/prob tiles.
    per_b = 2 * (2 * Lq * E + 2 * Lk * E) + 4 * (2 * Lq * Lk + Lq * E)
    budget = max(1, (_VMEM_LIMIT // 3) // max(1, per_b))
    # Aim for >= 2 grid steps so both v7x TensorCores get a slab.
    cap = min(budget, max(1, N // 2)) if N > 1 else 1
    tb = 1
    for d in range(1, N + 1):
        if N % d == 0 and d <= cap:
            tb = d
    return pl.pallas_call(
        functools.partial(_sdpa_kernel, nhead=nhead, scale=scale),
        out_shape=jax.ShapeDtypeStruct((N, Lq, E), jnp.bfloat16),
        grid=(N // tb,),
        in_specs=[
            pl.BlockSpec((tb, Lq, E), lambda b: (b, 0, 0)),
            pl.BlockSpec((tb, Lk, E), lambda b: (b, 0, 0)),
            pl.BlockSpec((tb, Lk, E), lambda b: (b, 0, 0)),
        ],
        out_specs=pl.BlockSpec((tb, Lq, E), lambda b: (b, 0, 0)),
        compiler_params=pltpu.CompilerParams(
            dimension_semantics=("parallel",),
            vmem_limit_bytes=_VMEM_LIMIT),
    )(q, k, v)


PALLAS_OPS = dict(linear=pallas_linear, linear_res_ln=pallas_linear_res_ln,
                  ffn=pallas_ffn, sdpa=pallas_sdpa)


# ----------------------------------------------------------------------------
# Pure-JAX reference ops (identical numerics: bf16 MXU inputs, f32 accumulate)
# ----------------------------------------------------------------------------
def _ref_linear(x, w, b):
    y = jnp.dot(x, w, preferred_element_type=jnp.float32) + b.reshape(1, -1)
    return y.astype(jnp.bfloat16)


def _ref_linear_res_ln(x, w, b, res, gamma, beta, eps=_EPS):
    z = (jnp.dot(x, w, preferred_element_type=jnp.float32) + b.reshape(1, -1)
         + res.astype(jnp.float32))
    mu = jnp.mean(z, axis=-1, keepdims=True)
    var = jnp.mean((z - mu) ** 2, axis=-1, keepdims=True)
    y = (z - mu) * jax.lax.rsqrt(var + eps) * gamma.reshape(1, -1) + beta.reshape(1, -1)
    return y.astype(jnp.bfloat16)


def _ref_ffn(x, w1, b1, w2, b2, gamma, beta, eps=_EPS):
    h = jnp.maximum(jnp.dot(x, w1, preferred_element_type=jnp.float32)
                    + b1.reshape(1, -1), 0.0)
    y = jnp.dot(h.astype(jnp.bfloat16), w2, preferred_element_type=jnp.float32)
    z = y + b2.reshape(1, -1) + x.astype(jnp.float32)
    mu = jnp.mean(z, axis=-1, keepdims=True)
    var = jnp.mean((z - mu) ** 2, axis=-1, keepdims=True)
    out = (z - mu) * jax.lax.rsqrt(var + eps) * gamma.reshape(1, -1) + beta.reshape(1, -1)
    return out.astype(jnp.bfloat16)


def _ref_sdpa(q, k, v, nhead):
    E = q.shape[-1]
    dh = E // nhead
    scale = 1.0 / math.sqrt(dh)
    outs = []
    for h in range(nhead):
        sl = slice(h * dh, (h + 1) * dh)
        s = jnp.einsum("bqd,bkd->bqk", q[..., sl], k[..., sl],
                       preferred_element_type=jnp.float32) * scale
        p = jax.nn.softmax(s, axis=-1)
        outs.append(jnp.einsum("bqk,bkd->bqd", p.astype(v.dtype), v[..., sl],
                               preferred_element_type=jnp.float32))
    return jnp.concatenate(outs, axis=-1).astype(jnp.bfloat16)


REF_OPS = dict(linear=_ref_linear, linear_res_ln=_ref_linear_res_ln,
               ffn=_ref_ffn, sdpa=_ref_sdpa)


# ----------------------------------------------------------------------------
# Transformer forward (encoder layer + decoder layer), parameterized by ops.
# Internal layout is batch-first (N, L, E) bf16 — the per-head split happens inside
# the SDPA kernel, so there are no head split/merge transposes at the XLA level.
# ----------------------------------------------------------------------------
def _mha_block(ops, query, keyval, p, gamma, beta, nhead, self_attn):
    N, Lq, E = query.shape
    Lk = keyval.shape[1]
    x2 = query.reshape(N * Lq, E)

    if self_attn:
        qkv = ops["linear"](x2, p["wqkv"], p["bqkv"])            # fused (E,3E) projection
        q, k, v = jnp.split(qkv, 3, axis=-1)
    else:
        m2 = keyval.reshape(N * Lk, E)
        q = ops["linear"](x2, p["wqkv"][:, :E], p["bqkv"][:E])
        kv = ops["linear"](m2, p["wqkv"][:, E:], p["bqkv"][E:])  # fused (E,2E) K/V projection
        k, v = jnp.split(kv, 2, axis=-1)

    q = q.reshape(N, Lq, E)
    k = k.reshape(N, Lk, E)
    v = v.reshape(N, Lk, E)
    o = ops["sdpa"](q, k, v, nhead)                              # (N, Lq, E) bf16

    # output projection with residual-add + LayerNorm fused into the epilogue
    y = ops["linear_res_ln"](o.reshape(N * Lq, E), p["wo"], p["bo"], x2, gamma, beta)
    return y.reshape(N, Lq, E)


def _encoder_layer(ops, src, p, nhead):
    N, S, E = src.shape
    x = _mha_block(ops, src, src, p["self_attn"], p["norm1_g"], p["norm1_b"], nhead, True)
    y = ops["ffn"](x.reshape(N * S, E), p["lin1_w"], p["lin1_b"],
                   p["lin2_w"], p["lin2_b"], p["norm2_g"], p["norm2_b"])
    return y.reshape(N, S, E)


def _decoder_layer(ops, tgt, memory, p, nhead):
    N, T, E = tgt.shape
    x = _mha_block(ops, tgt, tgt, p["self_attn"], p["norm1_g"], p["norm1_b"], nhead, True)
    x = _mha_block(ops, x, memory, p["cross_attn"], p["norm2_g"], p["norm2_b"], nhead, False)
    y = ops["ffn"](x.reshape(N * T, E), p["lin1_w"], p["lin1_b"],
                   p["lin2_w"], p["lin2_b"], p["norm3_g"], p["norm3_b"])
    return y.reshape(N, T, E)


def transformer_forward(ops, params, src, tgt, nhead):
    if src.shape[1] != tgt.shape[1]:
        raise RuntimeError("the batch number of src and tgt must be equal")
    # (S, N, E) seq-first boundary (nn.Transformer batch_first=False) -> batch-first bf16.
    src_b = jnp.transpose(src, (1, 0, 2)).astype(jnp.bfloat16)
    tgt_b = jnp.transpose(tgt, (1, 0, 2)).astype(jnp.bfloat16)
    memory = _encoder_layer(ops, src_b, params["encoder"], nhead)
    out = _decoder_layer(ops, tgt_b, memory, params["decoder"], nhead)
    return jnp.transpose(out, (1, 0, 2)).astype(jnp.float32)


# ----------------------------------------------------------------------------
# Deterministic parameter init (xavier_uniform_ on dim>1 params, like _reset_parameters)
# ----------------------------------------------------------------------------
def _xavier(key, shape):
    fan_out, fan_in = shape  # torch weight convention: (out_features, in_features)
    bound = math.sqrt(6.0 / (fan_in + fan_out))
    return jax.random.uniform(key, shape, jnp.float32, -bound, bound)


def _init_mha(key, d_model):
    k_in, k_out = jax.random.split(key)
    in_proj = _xavier(k_in, (3 * d_model, d_model))   # (3E, E) like torch in_proj_weight
    wo = _xavier(k_out, (d_model, d_model))
    return dict(
        wqkv=in_proj.T.astype(jnp.bfloat16),          # stored (in, out), bf16 for MXU/DMA
        bqkv=jnp.zeros((3 * d_model,), jnp.float32),
        wo=wo.T.astype(jnp.bfloat16),
        bo=jnp.zeros((d_model,), jnp.float32),
    )


def _init_common(key, d_model, dff):
    k1, k2 = jax.random.split(key)
    return dict(
        lin1_w=_xavier(k1, (dff, d_model)).T.astype(jnp.bfloat16),
        lin1_b=jnp.zeros((dff,), jnp.float32),
        lin2_w=_xavier(k2, (d_model, dff)).T.astype(jnp.bfloat16),
        lin2_b=jnp.zeros((d_model,), jnp.float32),
        norm1_g=jnp.ones((d_model,), jnp.float32), norm1_b=jnp.zeros((d_model,), jnp.float32),
        norm2_g=jnp.ones((d_model,), jnp.float32), norm2_b=jnp.zeros((d_model,), jnp.float32),
    )


def init_transformer_params(key, d_model, dff):
    ke, kd = jax.random.split(key)
    ke_a, ke_c = jax.random.split(ke)
    kd_a, kd_x, kd_c = jax.random.split(kd, 3)
    enc = dict(self_attn=_init_mha(ke_a, d_model), **_init_common(ke_c, d_model, dff))
    dec = dict(
        self_attn=_init_mha(kd_a, d_model),
        cross_attn=_init_mha(kd_x, d_model),
        **_init_common(kd_c, d_model, dff),
    )
    dec["norm3_g"] = jnp.ones((d_model,), jnp.float32)
    dec["norm3_b"] = jnp.zeros((d_model,), jnp.float32)
    return dict(encoder=enc, decoder=dec)


# ----------------------------------------------------------------------------
if __name__ == "__main__":
    d_model, nhead, dff = 64, 4, 128
    S_src, S_tgt, batch = 8, 8, 2

    root = jax.random.PRNGKey(0)
    k_params, k_src, k_tgt = jax.random.split(root, 3)
    params = init_transformer_params(k_params, d_model, dff)

    src = jax.random.normal(k_src, (S_src, batch, d_model), jnp.float32)
    tgt = jax.random.normal(k_tgt, (S_tgt, batch, d_model), jnp.float32)

    @jax.jit
    def run(src, tgt):
        return transformer_forward(PALLAS_OPS, params, src, tgt, nhead)

    out = jax.block_until_ready(run(src, tgt))

    # correctness check against a pure-JAX reference with identical numerics
    # (bf16 activations / MXU inputs, f32 accumulate); the approx-reciprocal softmax and
    # one-ulp bf16 rounding differences are the only deltas.
    ref = transformer_forward(REF_OPS, params, src, tgt, nhead)
    assert out.shape == (S_tgt, batch, d_model)
    assert bool(jnp.all(jnp.isfinite(out)))
    max_err = float(jnp.max(jnp.abs(out - ref)))
    assert max_err < 3e-2, max_err

    print("KERNEL_OK")
</pallas_src>

<mosaic_0001>
module attributes {stable_mosaic.version = 11 : i64} {
  func.func @_matmul_kernel(%arg0: i32, %arg1: i32, %arg2: i32, %arg3: memref<8x64xbf16, #tpu.memory_space<vmem>>, %arg4: memref<64x192xbf16, #tpu.memory_space<vmem>>, %arg5: memref<1x192xf32, #tpu.memory_space<vmem>>, %arg6: memref<8x192xbf16, #tpu.memory_space<vmem>>, %arg7: memref<8x192xf32, #tpu.memory_space<vmem>>) attributes {dimension_semantics = [#tpu.dimension_semantics<parallel>, #tpu.dimension_semantics<parallel>, #tpu.dimension_semantics<arbitrary>], iteration_bounds = array<i64: 2, 1, 1>, scalar_prefetch = 0 : i64, scratch_operands = 1 : i64, tpu.core_type = #tpu.core_type<tc>, window_params = [{transform_indices = @transform_0, window_bounds = array<i64: 8, 64>}, {transform_indices = @transform_1, window_bounds = array<i64: 64, 192>}, {transform_indices = @transform_2, window_bounds = array<i64: 1, 192>}, {transform_indices = @transform_3, window_bounds = array<i64: 8, 192>}]} {
    %c0_i32 = arith.constant 0 : i32
    %0 = arith.cmpi eq, %arg2, %c0_i32 : i32
    %1 = arith.extui %0 : i1 to i32
    %c0_i32_0 = arith.constant 0 : i32
    %2 = arith.cmpi ne, %1, %c0_i32_0 : i32
    scf.if %2 {
      %cst_10 = arith.constant 0.000000e+00 : f32
      %12 = vector.broadcast %cst_10 : f32 to vector<8x192xf32>
      %c0_11 = arith.constant 0 : index
      %c0_12 = arith.constant 0 : index
      %13 = vector.load %arg7[%c0_11, %c0_12] : memref<8x192xf32, #tpu.memory_space<vmem>>, vector<8x192xf32>
      tpu.vector_store %arg7[%c0_11, %c0_12], %12 {strides = array<i32>} : memref<8x192xf32, #tpu.memory_space<vmem>>, vector<8x192xf32>,
    } else {
    }
    %c0 = arith.constant 0 : index
    %c0_1 = arith.constant 0 : index
    %3 = vector.load %arg7[%c0, %c0_1] : memref<8x192xf32, #tpu.memory_space<vmem>>, vector<8x192xf32>
    %c0_2 = arith.constant 0 : index
    %c0_3 = arith.constant 0 : index
    %4 = vector.load %arg3[%c0_2, %c0_3] : memref<8x64xbf16, #tpu.memory_space<vmem>>, vector<8x64xbf16>
    %c0_4 = arith.constant 0 : index
    %c0_5 = arith.constant 0 : index
    %5 = vector.load %arg4[%c0_4, %c0_5] : memref<64x192xbf16, #tpu.memory_space<vmem>>, vector<64x192xbf16>
    %cst = arith.constant dense<0.000000e+00> : vector<8x192xf32>
    %6 = tpu.matmul %4, %5, %cst {dimension_numbers = #tpu.dot_dimension_numbers<[1], [0], [0], [1], [0, 0, 1, 1], [], []>} : vector<8x64xbf16>, vector<64x192xbf16>, vector<8x192xf32> -> vector<8x192xf32>
    %7 = arith.addf %3, %6 : vector<8x192xf32>
    %c0_6 = arith.constant 0 : index
    %c0_7 = arith.constant 0 : index
    %8 = vector.load %arg7[%c0_6, %c0_7] : memref<8x192xf32, #tpu.memory_space<vmem>>, vector<8x192xf32>
    tpu.vector_store %arg7[%c0_6, %c0_7], %7 {strides = array<i32>} : memref<8x192xf32, #tpu.memory_space<vmem>>, vector<8x192xf32>,
    %c0_i32_8 = arith.constant 0 : i32
    %9 = arith.cmpi eq, %arg2, %c0_i32_8 : i32
    %10 = arith.extui %9 : i1 to i32
    %c0_i32_9 = arith.constant 0 : i32
    %11 = arith.cmpi ne, %10, %c0_i32_9 : i32
    scf.if %11 {
      %c0_10 = arith.constant 0 : index
      %c0_11 = arith.constant 0 : index
      %12 = vector.load %arg7[%c0_10, %c0_11] : memref<8x192xf32, #tpu.memory_space<vmem>>, vector<8x192xf32>
      %c0_12 = arith.constant 0 : index
      %c0_13 = arith.constant 0 : index
      %13 = vector.load %arg5[%c0_12, %c0_13] : memref<1x192xf32, #tpu.memory_space<vmem>>, vector<1x192xf32>
      %14 = vector.broadcast %13 : vector<1x192xf32> to vector<8x192xf32>
      %15 = arith.addf %12, %14 : vector<8x192xf32>
      %16 = arith.truncf %15 : vector<8x192xf32> to vector<8x192xbf16>
      %c0_14 = arith.constant 0 : index
      %c0_15 = arith.constant 0 : index
      %17 = vector.load %arg6[%c0_14, %c0_15] : memref<8x192xbf16, #tpu.memory_space<vmem>>, vector<8x192xbf16>
      tpu.vector_store %arg6[%c0_14, %c0_15], %16 {strides = array<i32>} : memref<8x192xbf16, #tpu.memory_space<vmem>>, vector<8x192xbf16>,
    } else {
    }
    return
  }
  func.func @transform_0(%arg0: i32, %arg1: i32, %arg2: i32) -> (i32, i32) {
    %c0_i32 = arith.constant 0 : i32
    return %arg0, %arg2 : i32, i32
  }
  func.func @transform_1(%arg0: i32, %arg1: i32, %arg2: i32) -> (i32, i32) {
    %c0_i32 = arith.constant 0 : i32
    return %arg2, %arg1 : i32, i32
  }
  func.func @transform_2(%arg0: i32, %arg1: i32, %arg2: i32) -> (i32, i32) {
    %c0_i32 = arith.constant 0 : i32
    %c0_i32_0 = arith.constant 0 : i32
    return %c0_i32, %arg1 : i32, i32
  }
  func.func @transform_3(%arg0: i32, %arg1: i32, %arg2: i32) -> (i32, i32) {
    %c0_i32 = arith.constant 0 : i32
    return %arg0, %arg1 : i32, i32
  }
}

module attributes {stable_mosaic.version = 11 : i64} {
  func.func @_sdpa_kernel(%arg0: i32, %arg1: memref<1x8x64xbf16, #tpu.memory_space<vmem>>, %arg2: memref<1x8x64xbf16, #tpu.memory_space<vmem>>, %arg3: memref<1x8x64xbf16, #tpu.memory_space<vmem>>, %arg4: memref<1x8x64xbf16, #tpu.memory_space<vmem>>) attributes {dimension_semantics = [#tpu.dimension_semantics<parallel>], iteration_bounds = array<i64: 2>, scalar_prefetch = 0 : i64, scratch_operands = 0 : i64, tpu.core_type = #tpu.core_type<tc>, window_params = [{transform_indices = @transform_0, window_bounds = array<i64: 1, 8, 64>}, {transform_indices = @transform_1, window_bounds = array<i64: 1, 8, 64>}, {transform_indices = @transform_2, window_bounds = array<i64: 1, 8, 64>}, {transform_indices = @transform_3, window_bounds = array<i64: 1, 8, 64>}]} {
    %c0 = arith.constant 0 : index
    %c0_0 = arith.constant 0 : index
    %c0_1 = arith.constant 0 : index
    %0 = vector.load %arg1[%c0, %c0_0, %c0_1] : memref<1x8x64xbf16, #tpu.memory_space<vmem>>, vector<1x8x64xbf16>
    %c0_2 = arith.constant 0 : index
    %c0_3 = arith.constant 0 : index
    %c0_4 = arith.constant 0 : index
    %1 = vector.load %arg2[%c0_2, %c0_3, %c0_4] : memref<1x8x64xbf16, #tpu.memory_space<vmem>>, vector<1x8x64xbf16>
    %c0_5 = arith.constant 0 : index
    %c0_6 = arith.constant 0 : index
    %c0_7 = arith.constant 0 : index
    %2 = vector.load %arg3[%c0_5, %c0_6, %c0_7] : memref<1x8x64xbf16, #tpu.memory_space<vmem>>, vector<1x8x64xbf16>
    %3 = vector.extract_strided_slice %0 {offsets = [0, 0, 0], sizes = [1, 8, 16], strides = [1, 1, 1]} : vector<1x8x64xbf16> to vector<1x8x16xbf16>
    %4 = vector.extract_strided_slice %1 {offsets = [0, 0, 0], sizes = [1, 8, 16], strides = [1, 1, 1]} : vector<1x8x64xbf16> to vector<1x8x16xbf16>
    "tpu.trace_start"() <{level = 10 : i32, message = "bqd,bkd->bqk"}> : () -> ()
    %cst = arith.constant dense<0.000000e+00> : vector<1x8x8xf32>
    %5 = tpu.matmul %3, %4, %cst {dimension_numbers = #tpu.dot_dimension_numbers<[2], [2], [1], [1], [0, 0, 0, 1, 1, 1], [0], [0]>} : vector<1x8x16xbf16>, vector<1x8x16xbf16>, vector<1x8x8xf32> -> vector<1x8x8xf32>
    "tpu.trace_stop"() : () -> ()
    %cst_8 = arith.constant 2.500000e-01 : f32
    %6 = vector.broadcast %cst_8 : f32 to vector<1x8x8xf32>
    %7 = arith.mulf %5, %6 : vector<1x8x8xf32>
    %cst_9 = arith.constant dense<0xFF800000> : vector<1x8xf32>
    %8 = vector.multi_reduction <maximumf>, %7, %cst_9 [2] : vector<1x8x8xf32> to vector<1x8xf32>
    %9 = vector.shape_cast %8 : vector<1x8xf32> to vector<1x8x1xf32>
    %10 = vector.broadcast %9 : vector<1x8x1xf32> to vector<1x8x8xf32>
    %11 = arith.subf %7, %10 : vector<1x8x8xf32>
    %12 = math.exp %11 : vector<1x8x8xf32>
    %cst_10 = arith.constant dense<0.000000e+00> : vector<1x8xf32>
    %13 = vector.multi_reduction <add>, %12, %cst_10 [2] : vector<1x8x8xf32> to vector<1x8xf32>
    %14 = vector.shape_cast %13 : vector<1x8xf32> to vector<1x8x1xf32>
    %15 = tpu.reciprocal %14 {approx = true} : vector<1x8x1xf32> -> vector<1x8x1xf32>
    %16 = vector.broadcast %15 : vector<1x8x1xf32> to vector<1x8x8xf32>
    %17 = arith.mulf %12, %16 : vector<1x8x8xf32>
    %18 = arith.truncf %17 : vector<1x8x8xf32> to vector<1x8x8xbf16>
    %19 = vector.extract_strided_slice %2 {offsets = [0, 0, 0], sizes = [1, 8, 16], strides = [1, 1, 1]} : vector<1x8x64xbf16> to vector<1x8x16xbf16>
    "tpu.trace_start"() <{level = 10 : i32, message = "bqk,bkd->bqd"}> : () -> ()
    %cst_11 = arith.constant dense<0.000000e+00> : vector<1x8x16xf32>
    %20 = tpu.matmul %18, %19, %cst_11 {dimension_numbers = #tpu.dot_dimension_numbers<[2], [1], [1], [2], [0, 0, 0, 1, 1, 2], [0], [0]>} : vector<1x8x8xbf16>, vector<1x8x16xbf16>, vector<1x8x16xf32> -> vector<1x8x16xf32>
    "tpu.trace_stop"() : () -> ()
    %21 = vector.extract_strided_slice %0 {offsets = [0, 0, 16], sizes = [1, 8, 16], strides = [1, 1, 1]} : vector<1x8x64xbf16> to vector<1x8x16xbf16>
    %22 = vector.extract_strided_slice %1 {offsets = [0, 0, 16], sizes = [1, 8, 16], strides = [1, 1, 1]} : vector<1x8x64xbf16> to vector<1x8x16xbf16>
    "tpu.trace_start"() <{level = 10 : i32, message = "bqd,bkd->bqk"}> : () -> ()
    %cst_12 = arith.constant dense<0.000000e+00> : vector<1x8x8xf32>
    %23 = tpu.matmul %21, %22, %cst_12 {dimension_numbers = #tpu.dot_dimension_numbers<[2], [2], [1], [1], [0, 0, 0, 1, 1, 1], [0], [0]>} : vector<1x8x16xbf16>, vector<1x8x16xbf16>, vector<1x8x8xf32> -> vector<1x8x8xf32>
    "tpu.trace_stop"() : () -> ()
    %cst_13 = arith.constant 2.500000e-01 : f32
    %24 = vector.broadcast %cst_13 : f32 to vector<1x8x8xf32>
    %25 = arith.mulf %23, %24 : vector<1x8x8xf32>
    %cst_14 = arith.constant dense<0xFF800000> : vector<1x8xf32>
    %26 = vector.multi_reduction <maximumf>, %25, %cst_14 [2] : vector<1x8x8xf32> to vector<1x8xf32>
    %27 = vector.shape_cast %26 : vector<1x8xf32> to vector<1x8x1xf32>
    %28 = vector.broadcast %27 : vector<1x8x1xf32> to vector<1x8x8xf32>
    %29 = arith.subf %25, %28 : vector<1x8x8xf32>
    %30 = math.exp %29 : vector<1x8x8xf32>
    %cst_15 = arith.constant dense<0.000000e+00> : vector<1x8xf32>
    %31 = vector.multi_reduction <add>, %30, %cst_15 [2] : vector<1x8x8xf32> to vector<1x8xf32>
    %32 = vector.shape_cast %31 : vector<1x8xf32> to vector<1x8x1xf32>
    %33 = tpu.reciprocal %32 {approx = true} : vector<1x8x1xf32> -> vector<1x8x1xf32>
    %34 = vector.broadcast %33 : vector<1x8x1xf32> to vector<1x8x8xf32>
    %35 = arith.mulf %30, %34 : vector<1x8x8xf32>
    %36 = arith.truncf %35 : vector<1x8x8xf32> to vector<1x8x8xbf16>
    %37 = vector.extract_strided_slice %2 {offsets = [0, 0, 16], sizes = [1, 8, 16], strides = [1, 1, 1]} : vector<1x8x64xbf16> to vector<1x8x16xbf16>
    "tpu.trace_start"() <{level = 10 : i32, message = "bqk,bkd->bqd"}> : () -> ()
    %cst_16 = arith.constant dense<0.000000e+00> : vector<1x8x16xf32>
    %38 = tpu.matmul %36, %37, %cst_16 {dimension_numbers = #tpu.dot_dimension_numbers<[2], [1], [1], [2], [0, 0, 0, 1, 1, 2], [0], [0]>} : vector<1x8x8xbf16>, vector<1x8x16xbf16>, vector<1x8x16xf32> -> vector<1x8x16xf32>
    "tpu.trace_stop"() : () -> ()
    %39 = vector.extract_strided_slice %0 {offsets = [0, 0, 32], sizes = [1, 8, 16], strides = [1, 1, 1]} : vector<1x8x64xbf16> to vector<1x8x16xbf16>
    %40 = vector.extract_strided_slice %1 {offsets = [0, 0, 32], sizes = [1, 8, 16], strides = [1, 1, 1]} : vector<1x8x64xbf16> to vector<1x8x16xbf16>
    "tpu.trace_start"() <{level = 10 : i32, message = "bqd,bkd->bqk"}> : () -> ()
    %cst_17 = arith.constant dense<0.000000e+00> : vector<1x8x8xf32>
    %41 = tpu.matmul %39, %40, %cst_17 {dimension_numbers = #tpu.dot_dimension_numbers<[2], [2], [1], [1], [0, 0, 0, 1, 1, 1], [0], [0]>} : vector<1x8x16xbf16>, vector<1x8x16xbf16>, vector<1x8x8xf32> -> vector<1x8x8xf32>
    "tpu.trace_stop"() : () -> ()
    %cst_18 = arith.constant 2.500000e-01 : f32
    %42 = vector.broadcast %cst_18 : f32 to vector<1x8x8xf32>
    %43 = arith.mulf %41, %42 : vector<1x8x8xf32>
    %cst_19 = arith.constant dense<0xFF800000> : vector<1x8xf32>
    %44 = vector.multi_reduction <maximumf>, %43, %cst_19 [2] : vector<1x8x8xf32> to vector<1x8xf32>
    %45 = vector.shape_cast %44 : vector<1x8xf32> to vector<1x8x1xf32>
    %46 = vector.broadcast %45 : vector<1x8x1xf32> to vector<1x8x8xf32>
    %47 = arith.subf %43, %46 : vector<1x8x8xf32>
    %48 = math.exp %47 : vector<1x8x8xf32>
    %cst_20 = arith.constant dense<0.000000e+00> : vector<1x8xf32>
    %49 = vector.multi_reduction <add>, %48, %cst_20 [2] : vector<1x8x8xf32> to vector<1x8xf32>
    %50 = vector.shape_cast %49 : vector<1x8xf32> to vector<1x8x1xf32>
    %51 = tpu.reciprocal %50 {approx = true} : vector<1x8x1xf32> -> vector<1x8x1xf32>
    %52 = vector.broadcast %51 : vector<1x8x1xf32> to vector<1x8x8xf32>
    %53 = arith.mulf %48, %52 : vector<1x8x8xf32>
    %54 = arith.truncf %53 : vector<1x8x8xf32> to vector<1x8x8xbf16>
    %55 = vector.extract_strided_slice %2 {offsets = [0, 0, 32], sizes = [1, 8, 16], strides = [1, 1, 1]} : vector<1x8x64xbf16> to vector<1x8x16xbf16>
    "tpu.trace_start"() <{level = 10 : i32, message = "bqk,bkd->bqd"}> : () -> ()
    %cst_21 = arith.constant dense<0.000000e+00> : vector<1x8x16xf32>
    %56 = tpu.matmul %54, %55, %cst_21 {dimension_numbers = #tpu.dot_dimension_numbers<[2], [1], [1], [2], [0, 0, 0, 1, 1, 2], [0], [0]>} : vector<1x8x8xbf16>, vector<1x8x16xbf16>, vector<1x8x16xf32> -> vector<1x8x16xf32>
    "tpu.trace_stop"() : () -> ()
    %57 = vector.extract_strided_slice %0 {offsets = [0, 0, 48], sizes = [1, 8, 16], strides = [1, 1, 1]} : vector<1x8x64xbf16> to vector<1x8x16xbf16>
    %58 = vector.extract_strided_slice %1 {offsets = [0, 0, 48], sizes = [1, 8, 16], strides = [1, 1, 1]} : vector<1x8x64xbf16> to vector<1x8x16xbf16>
    "tpu.trace_start"() <{level = 10 : i32, message = "bqd,bkd->bqk"}> : () -> ()
    %cst_22 = arith.constant dense<0.000000e+00> : vector<1x8x8xf32>
    %59 = tpu.matmul %57, %58, %cst_22 {dimension_numbers = #tpu.dot_dimension_numbers<[2], [2], [1], [1], [0, 0, 0, 1, 1, 1], [0], [0]>} : vector<1x8x16xbf16>, vector<1x8x16xbf16>, vector<1x8x8xf32> -> vector<1x8x8xf32>
    "tpu.trace_stop"() : () -> ()
    %cst_23 = arith.constant 2.500000e-01 : f32
    %60 = vector.broadcast %cst_23 : f32 to vector<1x8x8xf32>
    %61 = arith.mulf %59, %60 : vector<1x8x8xf32>
    %cst_24 = arith.constant dense<0xFF800000> : vector<1x8xf32>
    %62 = vector.multi_reduction <maximumf>, %61, %cst_24 [2] : vector<1x8x8xf32> to vector<1x8xf32>
    %63 = vector.shape_cast %62 : vector<1x8xf32> to vector<1x8x1xf32>
    %64 = vector.broadcast %63 : vector<1x8x1xf32> to vector<1x8x8xf32>
    %65 = arith.subf %61, %64 : vector<1x8x8xf32>
    %66 = math.exp %65 : vector<1x8x8xf32>
    %cst_25 = arith.constant dense<0.000000e+00> : vector<1x8xf32>
    %67 = vector.multi_reduction <add>, %66, %cst_25 [2] : vector<1x8x8xf32> to vector<1x8xf32>
    %68 = vector.shape_cast %67 : vector<1x8xf32> to vector<1x8x1xf32>
    %69 = tpu.reciprocal %68 {approx = true} : vector<1x8x1xf32> -> vector<1x8x1xf32>
    %70 = vector.broadcast %69 : vector<1x8x1xf32> to vector<1x8x8xf32>
    %71 = arith.mulf %66, %70 : vector<1x8x8xf32>
    %72 = arith.truncf %71 : vector<1x8x8xf32> to vector<1x8x8xbf16>
    %73 = vector.extract_strided_slice %2 {offsets = [0, 0, 48], sizes = [1, 8, 16], strides = [1, 1, 1]} : vector<1x8x64xbf16> to vector<1x8x16xbf16>
    "tpu.trace_start"() <{level = 10 : i32, message = "bqk,bkd->bqd"}> : () -> ()
    %cst_26 = arith.constant dense<0.000000e+00> : vector<1x8x16xf32>
    %74 = tpu.matmul %72, %73, %cst_26 {dimension_numbers = #tpu.dot_dimension_numbers<[2], [1], [1], [2], [0, 0, 0, 1, 1, 2], [0], [0]>} : vector<1x8x8xbf16>, vector<1x8x16xbf16>, vector<1x8x16xf32> -> vector<1x8x16xf32>
    "tpu.trace_stop"() : () -> ()
    %75 = tpu.concatenate %20, %38, %56, %74 in 2 : vector<1x8x16xf32>, vector<1x8x16xf32>, vector<1x8x16xf32>, vector<1x8x16xf32> -> vector<1x8x64xf32>
    %76 = arith.truncf %75 : vector<1x8x64xf32> to vector<1x8x64xbf16>
    %c0_27 = arith.constant 0 : index
    %c0_28 = arith.constant 0 : index
    %c0_29 = arith.constant 0 : index
    %77 = vector.load %arg4[%c0_27, %c0_28, %c0_29] : memref<1x8x64xbf16, #tpu.memory_space<vmem>>, vector<1x8x64xbf16>
    tpu.vector_store %arg4[%c0_27, %c0_28, %c0_29], %76 {strides = array<i32>} : memref<1x8x64xbf16, #tpu.memory_space<vmem>>, vector<1x8x64xbf16>,
    return
  }
  func.func @transform_0(%arg0: i32) -> (i32, i32, i32) {
    %c0_i32 = arith.constant 0 : i32
    %c0_i32_0 = arith.constant 0 : i32
    %c0_i32_1 = arith.constant 0 : i32
    return %arg0, %c0_i32, %c0_i32_0 : i32, i32, i32
  }
  func.func @transform_1(%arg0: i32) -> (i32, i32, i32) {
    %c0_i32 = arith.constant 0 : i32
    %c0_i32_0 = arith.constant 0 : i32
    %c0_i32_1 = arith.constant 0 : i32
    return %arg0, %c0_i32, %c0_i32_0 : i32, i32, i32
  }
  func.func @transform_2(%arg0: i32) -> (i32, i32, i32) {
    %c0_i32 = arith.constant 0 : i32
    %c0_i32_0 = arith.constant 0 : i32
    %c0_i32_1 = arith.constant 0 : i32
    return %arg0, %c0_i32, %c0_i32_0 : i32, i32, i32
  }
  func.func @transform_3(%arg0: i32) -> (i32, i32, i32) {
    %c0_i32 = arith.constant 0 : i32
    %c0_i32_0 = arith.constant 0 : i32
    %c0_i32_1 = arith.constant 0 : i32
    return %arg0, %c0_i32, %c0_i32_0 : i32, i32, i32
  }
}

module attributes {stable_mosaic.version = 11 : i64} {
  func.func @_matmul_res_ln_kernel(%arg0: i32, %arg1: i32, %arg2: memref<8x64xbf16, #tpu.memory_space<vmem>>, %arg3: memref<64x64xbf16, #tpu.memory_space<vmem>>, %arg4: memref<1x64xf32, #tpu.memory_space<vmem>>, %arg5: memref<8x64xbf16, #tpu.memory_space<vmem>>, %arg6: memref<1x64xf32, #tpu.memory_space<vmem>>, %arg7: memref<1x64xf32, #tpu.memory_space<vmem>>, %arg8: memref<8x64xbf16, #tpu.memory_space<vmem>>, %arg9: memref<8x64xf32, #tpu.memory_space<vmem>>) attributes {dimension_semantics = [#tpu.dimension_semantics<parallel>, #tpu.dimension_semantics<arbitrary>], iteration_bounds = array<i64: 2, 1>, scalar_prefetch = 0 : i64, scratch_operands = 1 : i64, tpu.core_type = #tpu.core_type<tc>, window_params = [{transform_indices = @transform_0, window_bounds = array<i64: 8, 64>}, {transform_indices = @transform_1, window_bounds = array<i64: 64, 64>}, {pipeline_mode = #tpu.pipeline_mode<synchronous>, transform_indices = @transform_2, window_bounds = array<i64: 1, 64>}, {transform_indices = @transform_3, window_bounds = array<i64: 8, 64>}, {pipeline_mode = #tpu.pipeline_mode<synchronous>, transform_indices = @transform_4, window_bounds = array<i64: 1, 64>}, {pipeline_mode = #tpu.pipeline_mode<synchronous>, transform_indices = @transform_5, window_bounds = array<i64: 1, 64>}, {transform_indices = @transform_6, window_bounds = array<i64: 8, 64>}]} {
    %c0_i32 = arith.constant 0 : i32
    %0 = arith.cmpi eq, %arg1, %c0_i32 : i32
    %1 = arith.extui %0 : i1 to i32
    %c0_i32_0 = arith.constant 0 : i32
    %2 = arith.cmpi ne, %1, %c0_i32_0 : i32
    scf.if %2 {
      %cst_10 = arith.constant 0.000000e+00 : f32
      %12 = vector.broadcast %cst_10 : f32 to vector<8x64xf32>
      %c0_11 = arith.constant 0 : index
      %c0_12 = arith.constant 0 : index
      %13 = vector.load %arg9[%c0_11, %c0_12] : memref<8x64xf32, #tpu.memory_space<vmem>>, vector<8x64xf32>
      tpu.vector_store %arg9[%c0_11, %c0_12], %12 {strides = array<i32>} : memref<8x64xf32, #tpu.memory_space<vmem>>, vector<8x64xf32>,
    } else {
    }
    %c0 = arith.constant 0 : index
    %c0_1 = arith.constant 0 : index
    %3 = vector.load %arg9[%c0, %c0_1] : memref<8x64xf32, #tpu.memory_space<vmem>>, vector<8x64xf32>
    %c0_2 = arith.constant 0 : index
    %c0_3 = arith.constant 0 : index
    %4 = vector.load %arg2[%c0_2, %c0_3] : memref<8x64xbf16, #tpu.memory_space<vmem>>, vector<8x64xbf16>
    %c0_4 = arith.constant 0 : index
    %c0_5 = arith.constant 0 : index
    %5 = vector.load %arg3[%c0_4, %c0_5] : memref<64x64xbf16, #tpu.memory_space<vmem>>, vector<64x64xbf16>
    %cst = arith.constant dense<0.000000e+00> : vector<8x64xf32>
    %6 = tpu.matmul %4, %5, %cst {dimension_numbers = #tpu.dot_dimension_numbers<[1], [0], [0], [1], [0, 0, 1, 1], [], []>} : vector<8x64xbf16>, vector<64x64xbf16>, vector<8x64xf32> -> vector<8x64xf32>
    %7 = arith.addf %3, %6 : vector<8x64xf32>
    %c0_6 = arith.constant 0 : index
    %c0_7 = arith.constant 0 : index
    %8 = vector.load %arg9[%c0_6, %c0_7] : memref<8x64xf32, #tpu.memory_space<vmem>>, vector<8x64xf32>
    tpu.vector_store %arg9[%c0_6, %c0_7], %7 {strides = array<i32>} : memref<8x64xf32, #tpu.memory_space<vmem>>, vector<8x64xf32>,
    %c0_i32_8 = arith.constant 0 : i32
    %9 = arith.cmpi eq, %arg1, %c0_i32_8 : i32
    %10 = arith.extui %9 : i1 to i32
    %c0_i32_9 = arith.constant 0 : i32
    %11 = arith.cmpi ne, %10, %c0_i32_9 : i32
    scf.if %11 {
      %c0_10 = arith.constant 0 : index
      %c0_11 = arith.constant 0 : index
      %12 = vector.load %arg9[%c0_10, %c0_11] : memref<8x64xf32, #tpu.memory_space<vmem>>, vector<8x64xf32>
      %c0_12 = arith.constant 0 : index
      %c0_13 = arith.constant 0 : index
      %13 = vector.load %arg4[%c0_12, %c0_13] : memref<1x64xf32, #tpu.memory_space<vmem>>, vector<1x64xf32>
      %14 = vector.broadcast %13 : vector<1x64xf32> to vector<8x64xf32>
      %15 = arith.addf %12, %14 : vector<8x64xf32>
      %c0_14 = arith.constant 0 : index
      %c0_15 = arith.constant 0 : index
      %16 = vector.load %arg5[%c0_14, %c0_15] : memref<8x64xbf16, #tpu.memory_space<vmem>>, vector<8x64xbf16>
      %17 = arith.extf %16 : vector<8x64xbf16> to vector<8x64xf32>
      %18 = arith.addf %15, %17 : vector<8x64xf32>
      %cst_16 = arith.constant dense<0.000000e+00> : vector<8xf32>
      %19 = vector.multi_reduction <add>, %18, %cst_16 [1] : vector<8x64xf32> to vector<8xf32>
      %20 = vector.shape_cast %19 : vector<8xf32> to vector<8x1xf32>
      %cst_17 = arith.constant 6.400000e+01 : f32
      %21 = vector.broadcast %cst_17 : f32 to vector<8x1xf32>
      %22 = arith.divf %20, %21 : vector<8x1xf32>
      %23 = vector.broadcast %22 : vector<8x1xf32> to vector<8x64xf32>
      %24 = arith.subf %18, %23 : vector<8x64xf32>
      %25 = vector.broadcast %22 : vector<8x1xf32> to vector<8x64xf32>
      %26 = arith.subf %18, %25 : vector<8x64xf32>
      %27 = arith.mulf %24, %26 : vector<8x64xf32>
      %cst_18 = arith.constant dense<0.000000e+00> : vector<8xf32>
      %28 = vector.multi_reduction <add>, %27, %cst_18 [1] : vector<8x64xf32> to vector<8xf32>
      %29 = vector.shape_cast %28 : vector<8xf32> to vector<8x1xf32>
      %cst_19 = arith.constant 6.400000e+01 : f32
      %30 = vector.broadcast %cst_19 : f32 to vector<8x1xf32>
      %31 = arith.divf %29, %30 : vector<8x1xf32>
      %32 = vector.broadcast %22 : vector<8x1xf32> to vector<8x64xf32>
      %33 = arith.subf %18, %32 : vector<8x64xf32>
      %cst_20 = arith.constant 9.99999974E-6 : f32
      %34 = vector.broadcast %cst_20 : f32 to vector<8x1xf32>
      %35 = arith.addf %31, %34 : vector<8x1xf32>
      %36 = math.rsqrt %35 : vector<8x1xf32>
      %37 = vector.broadcast %36 : vector<8x1xf32> to vector<8x64xf32>
      %38 = arith.mulf %33, %37 : vector<8x64xf32>
      %c0_21 = arith.constant 0 : index
      %c0_22 = arith.constant 0 : index
      %39 = vector.load %arg6[%c0_21, %c0_22] : memref<1x64xf32, #tpu.memory_space<vmem>>, vector<1x64xf32>
      %40 = vector.broadcast %39 : vector<1x64xf32> to vector<8x64xf32>
      %41 = arith.mulf %38, %40 : vector<8x64xf32>
      %c0_23 = arith.constant 0 : index
      %c0_24 = arith.constant 0 : index
      %42 = vector.load %arg7[%c0_23, %c0_24] : memref<1x64xf32, #tpu.memory_space<vmem>>, vector<1x64xf32>
      %43 = vector.broadcast %42 : vector<1x64xf32> to vector<8x64xf32>
      %44 = arith.addf %41, %43 : vector<8x64xf32>
      %45 = arith.truncf %44 : vector<8x64xf32> to vector<8x64xbf16>
      %c0_25 = arith.constant 0 : index
      %c0_26 = arith.constant 0 : index
      %46 = vector.load %arg8[%c0_25, %c0_26] : memref<8x64xbf16, #tpu.memory_space<vmem>>, vector<8x64xbf16>
      tpu.vector_store %arg8[%c0_25, %c0_26], %45 {strides = array<i32>} : memref<8x64xbf16, #tpu.memory_space<vmem>>, vector<8x64xbf16>,
    } else {
    }
    return
  }
  func.func @transform_0(%arg0: i32, %arg1: i32) -> (i32, i32) {
    %c0_i32 = arith.constant 0 : i32
    return %arg0, %arg1 : i32, i32
  }
  func.func @transform_1(%arg0: i32, %arg1: i32) -> (i32, i32) {
    %c0_i32 = arith.constant 0 : i32
    %c0_i32_0 = arith.constant 0 : i32
    return %arg1, %c0_i32 : i32, i32
  }
  func.func @transform_2(%arg0: i32, %arg1: i32) -> (i32, i32) {
    %c0_i32 = arith.constant 0 : i32
    %c0_i32_0 = arith.constant 0 : i32
    %c0_i32_1 = arith.constant 0 : i32
    return %c0_i32, %c0_i32_0 : i32, i32
  }
  func.func @transform_3(%arg0: i32, %arg1: i32) -> (i32, i32) {
    %c0_i32 = arith.constant 0 : i32
    %c0_i32_0 = arith.constant 0 : i32
    return %arg0, %c0_i32 : i32, i32
  }
  func.func @transform_4(%arg0: i32, %arg1: i32) -> (i32, i32) {
    %c0_i32 = arith.constant 0 : i32
    %c0_i32_0 = arith.constant 0 : i32
    %c0_i32_1 = arith.constant 0 : i32
    return %c0_i32, %c0_i32_0 : i32, i32
  }
  func.func @transform_5(%arg0: i32, %arg1: i32) -> (i32, i32) {
    %c0_i32 = arith.constant 0 : i32
    %c0_i32_0 = arith.constant 0 : i32
    %c0_i32_1 = arith.constant 0 : i32
    return %c0_i32, %c0_i32_0 : i32, i32
  }
  func.func @transform_6(%arg0: i32, %arg1: i32) -> (i32, i32) {
    %c0_i32 = arith.constant 0 : i32
    %c0_i32_0 = arith.constant 0 : i32
    return %arg0, %c0_i32 : i32, i32
  }
}

module attributes {stable_mosaic.version = 11 : i64} {
  func.func @_matmul_kernel(%arg0: i32, %arg1: i32, %arg2: i32, %arg3: memref<8x64xbf16, #tpu.memory_space<vmem>>, %arg4: memref<64x64xbf16, #tpu.memory_space<vmem>>, %arg5: memref<1x64xf32, #tpu.memory_space<vmem>>, %arg6: memref<8x64xbf16, #tpu.memory_space<vmem>>, %arg7: memref<8x64xf32, #tpu.memory_space<vmem>>) attributes {dimension_semantics = [#tpu.dimension_semantics<parallel>, #tpu.dimension_semantics<parallel>, #tpu.dimension_semantics<arbitrary>], iteration_bounds = array<i64: 2, 1, 1>, scalar_prefetch = 0 : i64, scratch_operands = 1 : i64, tpu.core_type = #tpu.core_type<tc>, window_params = [{transform_indices = @transform_0, window_bounds = array<i64: 8, 64>}, {transform_indices = @transform_1, window_bounds = array<i64: 64, 64>}, {transform_indices = @transform_2, window_bounds = array<i64: 1, 64>}, {transform_indices = @transform_3, window_bounds = array<i64: 8, 64>}]} {
    %c0_i32 = arith.constant 0 : i32
    %0 = arith.cmpi eq, %arg2, %c0_i32 : i32
    %1 = arith.extui %0 : i1 to i32
    %c0_i32_0 = arith.constant 0 : i32
    %2 = arith.cmpi ne, %1, %c0_i32_0 : i32
    scf.if %2 {
      %cst_10 = arith.constant 0.000000e+00 : f32
      %12 = vector.broadcast %cst_10 : f32 to vector<8x64xf32>
      %c0_11 = arith.constant 0 : index
      %c0_12 = arith.constant 0 : index
      %13 = vector.load %arg7[%c0_11, %c0_12] : memref<8x64xf32, #tpu.memory_space<vmem>>, vector<8x64xf32>
      tpu.vector_store %arg7[%c0_11, %c0_12], %12 {strides = array<i32>} : memref<8x64xf32, #tpu.memory_space<vmem>>, vector<8x64xf32>,
    } else {
    }
    %c0 = arith.constant 0 : index
    %c0_1 = arith.constant 0 : index
    %3 = vector.load %arg7[%c0, %c0_1] : memref<8x64xf32, #tpu.memory_space<vmem>>, vector<8x64xf32>
    %c0_2 = arith.constant 0 : index
    %c0_3 = arith.constant 0 : index
    %4 = vector.load %arg3[%c0_2, %c0_3] : memref<8x64xbf16, #tpu.memory_space<vmem>>, vector<8x64xbf16>
    %c0_4 = arith.constant 0 : index
    %c0_5 = arith.constant 0 : index
    %5 = vector.load %arg4[%c0_4, %c0_5] : memref<64x64xbf16, #tpu.memory_space<vmem>>, vector<64x64xbf16>
    %cst = arith.constant dense<0.000000e+00> : vector<8x64xf32>
    %6 = tpu.matmul %4, %5, %cst {dimension_numbers = #tpu.dot_dimension_numbers<[1], [0], [0], [1], [0, 0, 1, 1], [], []>} : vector<8x64xbf16>, vector<64x64xbf16>, vector<8x64xf32> -> vector<8x64xf32>
    %7 = arith.addf %3, %6 : vector<8x64xf32>
    %c0_6 = arith.constant 0 : index
    %c0_7 = arith.constant 0 : index
    %8 = vector.load %arg7[%c0_6, %c0_7] : memref<8x64xf32, #tpu.memory_space<vmem>>, vector<8x64xf32>
    tpu.vector_store %arg7[%c0_6, %c0_7], %7 {strides = array<i32>} : memref<8x64xf32, #tpu.memory_space<vmem>>, vector<8x64xf32>,
    %c0_i32_8 = arith.constant 0 : i32
    %9 = arith.cmpi eq, %arg2, %c0_i32_8 : i32
    %10 = arith.extui %9 : i1 to i32
    %c0_i32_9 = arith.constant 0 : i32
    %11 = arith.cmpi ne, %10, %c0_i32_9 : i32
    scf.if %11 {
      %c0_10 = arith.constant 0 : index
      %c0_11 = arith.constant 0 : index
      %12 = vector.load %arg7[%c0_10, %c0_11] : memref<8x64xf32, #tpu.memory_space<vmem>>, vector<8x64xf32>
      %c0_12 = arith.constant 0 : index
      %c0_13 = arith.constant 0 : index
      %13 = vector.load %arg5[%c0_12, %c0_13] : memref<1x64xf32, #tpu.memory_space<vmem>>, vector<1x64xf32>
      %14 = vector.broadcast %13 : vector<1x64xf32> to vector<8x64xf32>
      %15 = arith.addf %12, %14 : vector<8x64xf32>
      %16 = arith.truncf %15 : vector<8x64xf32> to vector<8x64xbf16>
      %c0_14 = arith.constant 0 : index
      %c0_15 = arith.constant 0 : index
      %17 = vector.load %arg6[%c0_14, %c0_15] : memref<8x64xbf16, #tpu.memory_space<vmem>>, vector<8x64xbf16>
      tpu.vector_store %arg6[%c0_14, %c0_15], %16 {strides = array<i32>} : memref<8x64xbf16, #tpu.memory_space<vmem>>, vector<8x64xbf16>,
    } else {
    }
    return
  }
  func.func @transform_0(%arg0: i32, %arg1: i32, %arg2: i32) -> (i32, i32) {
    %c0_i32 = arith.constant 0 : i32
    return %arg0, %arg2 : i32, i32
  }
  func.func @transform_1(%arg0: i32, %arg1: i32, %arg2: i32) -> (i32, i32) {
    %c0_i32 = arith.constant 0 : i32
    return %arg2, %arg1 : i32, i32
  }
  func.func @transform_2(%arg0: i32, %arg1: i32, %arg2: i32) -> (i32, i32) {
    %c0_i32 = arith.constant 0 : i32
    %c0_i32_0 = arith.constant 0 : i32
    return %c0_i32, %arg1 : i32, i32
  }
  func.func @transform_3(%arg0: i32, %arg1: i32, %arg2: i32) -> (i32, i32) {
    %c0_i32 = arith.constant 0 : i32
    return %arg0, %arg1 : i32, i32
  }
}

module attributes {stable_mosaic.version = 11 : i64} {
  func.func @_matmul_kernel(%arg0: i32, %arg1: i32, %arg2: i32, %arg3: memref<8x64xbf16, #tpu.memory_space<vmem>>, %arg4: memref<64x128xbf16, #tpu.memory_space<vmem>>, %arg5: memref<1x128xf32, #tpu.memory_space<vmem>>, %arg6: memref<8x128xbf16, #tpu.memory_space<vmem>>, %arg7: memref<8x128xf32, #tpu.memory_space<vmem>>) attributes {dimension_semantics = [#tpu.dimension_semantics<parallel>, #tpu.dimension_semantics<parallel>, #tpu.dimension_semantics<arbitrary>], iteration_bounds = array<i64: 2, 1, 1>, scalar_prefetch = 0 : i64, scratch_operands = 1 : i64, tpu.core_type = #tpu.core_type<tc>, window_params = [{transform_indices = @transform_0, window_bounds = array<i64: 8, 64>}, {transform_indices = @transform_1, window_bounds = array<i64: 64, 128>}, {transform_indices = @transform_2, window_bounds = array<i64: 1, 128>}, {transform_indices = @transform_3, window_bounds = array<i64: 8, 128>}]} {
    %c0_i32 = arith.constant 0 : i32
    %0 = arith.cmpi eq, %arg2, %c0_i32 : i32
    %1 = arith.extui %0 : i1 to i32
    %c0_i32_0 = arith.constant 0 : i32
    %2 = arith.cmpi ne, %1, %c0_i32_0 : i32
    scf.if %2 {
      %cst_10 = arith.constant 0.000000e+00 : f32
      %12 = vector.broadcast %cst_10 : f32 to vector<8x128xf32>
      %c0_11 = arith.constant 0 : index
      %c0_12 = arith.constant 0 : index
      %13 = vector.load %arg7[%c0_11, %c0_12] : memref<8x128xf32, #tpu.memory_space<vmem>>, vector<8x128xf32>
      tpu.vector_store %arg7[%c0_11, %c0_12], %12 {strides = array<i32>} : memref<8x128xf32, #tpu.memory_space<vmem>>, vector<8x128xf32>,
    } else {
    }
    %c0 = arith.constant 0 : index
    %c0_1 = arith.constant 0 : index
    %3 = vector.load %arg7[%c0, %c0_1] : memref<8x128xf32, #tpu.memory_space<vmem>>, vector<8x128xf32>
    %c0_2 = arith.constant 0 : index
    %c0_3 = arith.constant 0 : index
    %4 = vector.load %arg3[%c0_2, %c0_3] : memref<8x64xbf16, #tpu.memory_space<vmem>>, vector<8x64xbf16>
    %c0_4 = arith.constant 0 : index
    %c0_5 = arith.constant 0 : index
    %5 = vector.load %arg4[%c0_4, %c0_5] : memref<64x128xbf16, #tpu.memory_space<vmem>>, vector<64x128xbf16>
    %cst = arith.constant dense<0.000000e+00> : vector<8x128xf32>
    %6 = tpu.matmul %4, %5, %cst {dimension_numbers = #tpu.dot_dimension_numbers<[1], [0], [0], [1], [0, 0, 1, 1], [], []>} : vector<8x64xbf16>, vector<64x128xbf16>, vector<8x128xf32> -> vector<8x128xf32>
    %7 = arith.addf %3, %6 : vector<8x128xf32>
    %c0_6 = arith.constant 0 : index
    %c0_7 = arith.constant 0 : index
    %8 = vector.load %arg7[%c0_6, %c0_7] : memref<8x128xf32, #tpu.memory_space<vmem>>, vector<8x128xf32>
    tpu.vector_store %arg7[%c0_6, %c0_7], %7 {strides = array<i32>} : memref<8x128xf32, #tpu.memory_space<vmem>>, vector<8x128xf32>,
    %c0_i32_8 = arith.constant 0 : i32
    %9 = arith.cmpi eq, %arg2, %c0_i32_8 : i32
    %10 = arith.extui %9 : i1 to i32
    %c0_i32_9 = arith.constant 0 : i32
    %11 = arith.cmpi ne, %10, %c0_i32_9 : i32
    scf.if %11 {
      %c0_10 = arith.constant 0 : index
      %c0_11 = arith.constant 0 : index
      %12 = vector.load %arg7[%c0_10, %c0_11] : memref<8x128xf32, #tpu.memory_space<vmem>>, vector<8x128xf32>
      %c0_12 = arith.constant 0 : index
      %c0_13 = arith.constant 0 : index
      %13 = vector.load %arg5[%c0_12, %c0_13] : memref<1x128xf32, #tpu.memory_space<vmem>>, vector<1x128xf32>
      %14 = vector.broadcast %13 : vector<1x128xf32> to vector<8x128xf32>
      %15 = arith.addf %12, %14 : vector<8x128xf32>
      %16 = arith.truncf %15 : vector<8x128xf32> to vector<8x128xbf16>
      %c0_14 = arith.constant 0 : index
      %c0_15 = arith.constant 0 : index
      %17 = vector.load %arg6[%c0_14, %c0_15] : memref<8x128xbf16, #tpu.memory_space<vmem>>, vector<8x128xbf16>
      tpu.vector_store %arg6[%c0_14, %c0_15], %16 {strides = array<i32>} : memref<8x128xbf16, #tpu.memory_space<vmem>>, vector<8x128xbf16>,
    } else {
    }
    return
  }
  func.func @transform_0(%arg0: i32, %arg1: i32, %arg2: i32) -> (i32, i32) {
    %c0_i32 = arith.constant 0 : i32
    return %arg0, %arg2 : i32, i32
  }
  func.func @transform_1(%arg0: i32, %arg1: i32, %arg2: i32) -> (i32, i32) {
    %c0_i32 = arith.constant 0 : i32
    return %arg2, %arg1 : i32, i32
  }
  func.func @transform_2(%arg0: i32, %arg1: i32, %arg2: i32) -> (i32, i32) {
    %c0_i32 = arith.constant 0 : i32
    %c0_i32_0 = arith.constant 0 : i32
    return %c0_i32, %arg1 : i32, i32
  }
  func.func @transform_3(%arg0: i32, %arg1: i32, %arg2: i32) -> (i32, i32) {
    %c0_i32 = arith.constant 0 : i32
    return %arg0, %arg1 : i32, i32
  }
}

module attributes {stable_mosaic.version = 11 : i64} {
  func.func @_ffn_kernel(%arg0: i32, %arg1: i32, %arg2: memref<8x64xbf16, #tpu.memory_space<vmem>>, %arg3: memref<64x128xbf16, #tpu.memory_space<vmem>>, %arg4: memref<1x128xf32, #tpu.memory_space<vmem>>, %arg5: memref<128x64xbf16, #tpu.memory_space<vmem>>, %arg6: memref<1x64xf32, #tpu.memory_space<vmem>>, %arg7: memref<1x64xf32, #tpu.memory_space<vmem>>, %arg8: memref<1x64xf32, #tpu.memory_space<vmem>>, %arg9: memref<8x64xbf16, #tpu.memory_space<vmem>>, %arg10: memref<8x64xf32, #tpu.memory_space<vmem>>) attributes {dimension_semantics = [#tpu.dimension_semantics<parallel>, #tpu.dimension_semantics<arbitrary>], iteration_bounds = array<i64: 2, 1>, scalar_prefetch = 0 : i64, scratch_operands = 1 : i64, tpu.core_type = #tpu.core_type<tc>, window_params = [{transform_indices = @transform_0, window_bounds = array<i64: 8, 64>}, {transform_indices = @transform_1, window_bounds = array<i64: 64, 128>}, {transform_indices = @transform_2, window_bounds = array<i64: 1, 128>}, {transform_indices = @transform_3, window_bounds = array<i64: 128, 64>}, {pipeline_mode = #tpu.pipeline_mode<synchronous>, transform_indices = @transform_4, window_bounds = array<i64: 1, 64>}, {pipeline_mode = #tpu.pipeline_mode<synchronous>, transform_indices = @transform_5, window_bounds = array<i64: 1, 64>}, {pipeline_mode = #tpu.pipeline_mode<synchronous>, transform_indices = @transform_6, window_bounds = array<i64: 1, 64>}, {transform_indices = @transform_7, window_bounds = array<i64: 8, 64>}]} {
    %c0_i32 = arith.constant 0 : i32
    %0 = arith.cmpi eq, %arg1, %c0_i32 : i32
    %1 = arith.extui %0 : i1 to i32
    %c0_i32_0 = arith.constant 0 : i32
    %2 = arith.cmpi ne, %1, %c0_i32_0 : i32
    scf.if %2 {
      %cst_16 = arith.constant 0.000000e+00 : f32
      %20 = vector.broadcast %cst_16 : f32 to vector<8x64xf32>
      %c0_17 = arith.constant 0 : index
      %c0_18 = arith.constant 0 : index
      %21 = vector.load %arg10[%c0_17, %c0_18] : memref<8x64xf32, #tpu.memory_space<vmem>>, vector<8x64xf32>
      tpu.vector_store %arg10[%c0_17, %c0_18], %20 {strides = array<i32>} : memref<8x64xf32, #tpu.memory_space<vmem>>, vector<8x64xf32>,
    } else {
    }
    %c0 = arith.constant 0 : index
    %c0_1 = arith.constant 0 : index
    %3 = vector.load %arg2[%c0, %c0_1] : memref<8x64xbf16, #tpu.memory_space<vmem>>, vector<8x64xbf16>
    %c0_2 = arith.constant 0 : index
    %c0_3 = arith.constant 0 : index
    %4 = vector.load %arg3[%c0_2, %c0_3] : memref<64x128xbf16, #tpu.memory_space<vmem>>, vector<64x128xbf16>
    %cst = arith.constant dense<0.000000e+00> : vector<8x128xf32>
    %5 = tpu.matmul %3, %4, %cst {dimension_numbers = #tpu.dot_dimension_numbers<[1], [0], [0], [1], [0, 0, 1, 1], [], []>} : vector<8x64xbf16>, vector<64x128xbf16>, vector<8x128xf32> -> vector<8x128xf32>
    %c0_4 = arith.constant 0 : index
    %c0_5 = arith.constant 0 : index
    %6 = vector.load %arg4[%c0_4, %c0_5] : memref<1x128xf32, #tpu.memory_space<vmem>>, vector<1x128xf32>
    %7 = vector.broadcast %6 : vector<1x128xf32> to vector<8x128xf32>
    %8 = arith.addf %5, %7 : vector<8x128xf32>
    %cst_6 = arith.constant 0.000000e+00 : f32
    %9 = vector.broadcast %cst_6 : f32 to vector<8x128xf32>
    %10 = arith.maximumf %8, %9 : vector<8x128xf32>
    %c0_7 = arith.constant 0 : index
    %c0_8 = arith.constant 0 : index
    %11 = vector.load %arg10[%c0_7, %c0_8] : memref<8x64xf32, #tpu.memory_space<vmem>>, vector<8x64xf32>
    %12 = arith.truncf %10 : vector<8x128xf32> to vector<8x128xbf16>
    %c0_9 = arith.constant 0 : index
    %c0_10 = arith.constant 0 : index
    %13 = vector.load %arg5[%c0_9, %c0_10] : memref<128x64xbf16, #tpu.memory_space<vmem>>, vector<128x64xbf16>
    %cst_11 = arith.constant dense<0.000000e+00> : vector<8x64xf32>
    %14 = tpu.matmul %12, %13, %cst_11 {dimension_numbers = #tpu.dot_dimension_numbers<[1], [0], [0], [1], [0, 0, 1, 1], [], []>} : vector<8x128xbf16>, vector<128x64xbf16>, vector<8x64xf32> -> vector<8x64xf32>
    %15 = arith.addf %11, %14 : vector<8x64xf32>
    %c0_12 = arith.constant 0 : index
    %c0_13 = arith.constant 0 : index
    %16 = vector.load %arg10[%c0_12, %c0_13] : memref<8x64xf32, #tpu.memory_space<vmem>>, vector<8x64xf32>
    tpu.vector_store %arg10[%c0_12, %c0_13], %15 {strides = array<i32>} : memref<8x64xf32, #tpu.memory_space<vmem>>, vector<8x64xf32>,
    %c0_i32_14 = arith.constant 0 : i32
    %17 = arith.cmpi eq, %arg1, %c0_i32_14 : i32
    %18 = arith.extui %17 : i1 to i32
    %c0_i32_15 = arith.constant 0 : i32
    %19 = arith.cmpi ne, %18, %c0_i32_15 : i32
    scf.if %19 {
      %c0_16 = arith.constant 0 : index
      %c0_17 = arith.constant 0 : index
      %20 = vector.load %arg10[%c0_16, %c0_17] : memref<8x64xf32, #tpu.memory_space<vmem>>, vector<8x64xf32>
      %c0_18 = arith.constant 0 : index
      %c0_19 = arith.constant 0 : index
      %21 = vector.load %arg6[%c0_18, %c0_19] : memref<1x64xf32, #tpu.memory_space<vmem>>, vector<1x64xf32>
      %22 = vector.broadcast %21 : vector<1x64xf32> to vector<8x64xf32>
      %23 = arith.addf %20, %22 : vector<8x64xf32>
      %c0_20 = arith.constant 0 : index
      %c0_21 = arith.constant 0 : index
      %24 = vector.load %arg2[%c0_20, %c0_21] : memref<8x64xbf16, #tpu.memory_space<vmem>>, vector<8x64xbf16>
      %25 = arith.extf %24 : vector<8x64xbf16> to vector<8x64xf32>
      %26 = arith.addf %23, %25 : vector<8x64xf32>
      %cst_22 = arith.constant dense<0.000000e+00> : vector<8xf32>
      %27 = vector.multi_reduction <add>, %26, %cst_22 [1] : vector<8x64xf32> to vector<8xf32>
      %28 = vector.shape_cast %27 : vector<8xf32> to vector<8x1xf32>
      %cst_23 = arith.constant 6.400000e+01 : f32
      %29 = vector.broadcast %cst_23 : f32 to vector<8x1xf32>
      %30 = arith.divf %28, %29 : vector<8x1xf32>
      %31 = vector.broadcast %30 : vector<8x1xf32> to vector<8x64xf32>
      %32 = arith.subf %26, %31 : vector<8x64xf32>
      %33 = vector.broadcast %30 : vector<8x1xf32> to vector<8x64xf32>
      %34 = arith.subf %26, %33 : vector<8x64xf32>
      %35 = arith.mulf %32, %34 : vector<8x64xf32>
      %cst_24 = arith.constant dense<0.000000e+00> : vector<8xf32>
      %36 = vector.multi_reduction <add>, %35, %cst_24 [1] : vector<8x64xf32> to vector<8xf32>
      %37 = vector.shape_cast %36 : vector<8xf32> to vector<8x1xf32>
      %cst_25 = arith.constant 6.400000e+01 : f32
      %38 = vector.broadcast %cst_25 : f32 to vector<8x1xf32>
      %39 = arith.divf %37, %38 : vector<8x1xf32>
      %40 = vector.broadcast %30 : vector<8x1xf32> to vector<8x64xf32>
      %41 = arith.subf %26, %40 : vector<8x64xf32>
      %cst_26 = arith.constant 9.99999974E-6 : f32
      %42 = vector.broadcast %cst_26 : f32 to vector<8x1xf32>
      %43 = arith.addf %39, %42 : vector<8x1xf32>
      %44 = math.rsqrt %43 : vector<8x1xf32>
      %45 = vector.broadcast %44 : vector<8x1xf32> to vector<8x64xf32>
      %46 = arith.mulf %41, %45 : vector<8x64xf32>
      %c0_27 = arith.constant 0 : index
      %c0_28 = arith.constant 0 : index
      %47 = vector.load %arg7[%c0_27, %c0_28] : memref<1x64xf32, #tpu.memory_space<vmem>>, vector<1x64xf32>
      %48 = vector.broadcast %47 : vector<1x64xf32> to vector<8x64xf32>
      %49 = arith.mulf %46, %48 : vector<8x64xf32>
      %c0_29 = arith.constant 0 : index
      %c0_30 = arith.constant 0 : index
      %50 = vector.load %arg8[%c0_29, %c0_30] : memref<1x64xf32, #tpu.memory_space<vmem>>, vector<1x64xf32>
      %51 = vector.broadcast %50 : vector<1x64xf32> to vector<8x64xf32>
      %52 = arith.addf %49, %51 : vector<8x64xf32>
      %53 = arith.truncf %52 : vector<8x64xf32> to vector<8x64xbf16>
      %c0_31 = arith.constant 0 : index
      %c0_32 = arith.constant 0 : index
      %54 = vector.load %arg9[%c0_31, %c0_32] : memref<8x64xbf16, #tpu.memory_space<vmem>>, vector<8x64xbf16>
      tpu.vector_store %arg9[%c0_31, %c0_32], %53 {strides = array<i32>} : memref<8x64xbf16, #tpu.memory_space<vmem>>, vector<8x64xbf16>,
    } else {
    }
    return
  }
  func.func @transform_0(%arg0: i32, %arg1: i32) -> (i32, i32) {
    %c0_i32 = arith.constant 0 : i32
    %c0_i32_0 = arith.constant 0 : i32
    return %arg0, %c0_i32 : i32, i32
  }
  func.func @transform_1(%arg0: i32, %arg1: i32) -> (i32, i32) {
    %c0_i32 = arith.constant 0 : i32
    %c0_i32_0 = arith.constant 0 : i32
    return %c0_i32, %arg1 : i32, i32
  }
  func.func @transform_2(%arg0: i32, %arg1: i32) -> (i32, i32) {
    %c0_i32 = arith.constant 0 : i32
    %c0_i32_0 = arith.constant 0 : i32
    return %c0_i32, %arg1 : i32, i32
  }
  func.func @transform_3(%arg0: i32, %arg1: i32) -> (i32, i32) {
    %c0_i32 = arith.constant 0 : i32
    %c0_i32_0 = arith.constant 0 : i32
    return %arg1, %c0_i32 : i32, i32
  }
  func.func @transform_4(%arg0: i32, %arg1: i32) -> (i32, i32) {
    %c0_i32 = arith.constant 0 : i32
    %c0_i32_0 = arith.constant 0 : i32
    %c0_i32_1 = arith.constant 0 : i32
    return %c0_i32, %c0_i32_0 : i32, i32
  }
  func.func @transform_5(%arg0: i32, %arg1: i32) -> (i32, i32) {
    %c0_i32 = arith.constant 0 : i32
    %c0_i32_0 = arith.constant 0 : i32
    %c0_i32_1 = arith.constant 0 : i32
    return %c0_i32, %c0_i32_0 : i32, i32
  }
  func.func @transform_6(%arg0: i32, %arg1: i32) -> (i32, i32) {
    %c0_i32 = arith.constant 0 : i32
    %c0_i32_0 = arith.constant 0 : i32
    %c0_i32_1 = arith.constant 0 : i32
    return %c0_i32, %c0_i32_0 : i32, i32
  }
  func.func @transform_7(%arg0: i32, %arg1: i32) -> (i32, i32) {
    %c0_i32 = arith.constant 0 : i32
    %c0_i32_0 = arith.constant 0 : i32
    return %arg0, %c0_i32 : i32, i32
  }
}

</mosaic_0001>

<bundles_post_ra>
// kernel: run.16
= control target key start
LH: loop header
LB: loop body
LE: loop exit
PB: predicated region body
PF: predicated region fallthrough
CT: control target
= control target key end

     0   :  { %s636_s12 = smov 0   ;;  %s638_s13 = smov 0   ;;  %s703_s0 = inlined_call_operand.vmem [shape: bf16[16,64], index: 0, kind: input, shape index: {}]   ;;  %s704_s1 = inlined_call_operand.vmem [shape: bf16[64,192], index: 1, kind: input, shape index: {}]   ;;  %s705_s2 = inlined_call_operand.vmem [shape: f32[1,192], index: 2, kind: input, shape index: {}]   ;;  %s706_s3 = inlined_call_operand.vmem [shape: bf16[16,192], index: 3, kind: output, shape index: {}]  }
   0x1   :  { %s640_s14 = smov 0  }
   0x2 LB: > { %s32_s15 = sadd.s32 1, %s608_s13  ;;  %p534_p0 = scmp.ge.s32.totalorder %s612_s14, 1  ;;  %s612_s14 = sphi %s640_s14, %s13_s14   ;;  %s608_s13 = sphi %s638_s13, %s708_s13   ;;  %s604_s12 = sphi %s636_s12, %s707_s12  }
   0x3   : > { %p34_p1 = scmp.ge.s32.totalorder %s32_s15, 2  ;;  %p191_p2 = scmp.lt.s32.totalorder %s612_s14, 3 }
   0x5   : > { %s710_s15 = smov (%p34_p1, %s32_s15), 0  ;;  %p192_p3 = pnand %p534_p0, %p191_p2 }
   0x6   : > { %v578_v0 = vld [vmem:[%s704_s1 + $0x4] ss:$8 sps:$4 sm:$0xff] (!%p192_p3)   ;;  %p235_p4 = scmp.lt.s32.totalorder (!%p192_p3), %s604_s12, 1  ;;  %v580_v1 = vld [vmem:[%s704_s1] ss:$8 sps:$4 sm:$0xff] (!%p192_p3)   ;;  %v614_v2 = vmov (!%p192_p3), 0   ;;  %v384_v11 = vlaneseq (!%p192_p3) }
   0x7   : > { %195 = sbr.rel (%p192_p3) target bundleno = 251 (0xfb), region = 32  ;;  %364 = vmatprep.mubr.bf16.mxu0 (!%p192_p3), %v614_v2  ;;  %vm275_vm0 = vcmask (!%p192_p3), 523264   ;;  %332 = vmatprep.subr.bf16.mxu0 (!%p192_p3), %v578_v0  ;;  %v581_v3 = vld [vmem:[%s704_s1 + $0x14] ss:$8 sps:$4 sm:$0xff] (!%p192_p3)   ;;  %v615_v4 = vmov (!%p192_p3), 0.0   ;;  %vm404_vm1 = vcmask (!%p192_p3), 1043456  }
   0x8   : > { %276 = vst.msk [vmem:[#allocation2 + $0x8] sm:$0xff] (!%p192_p3), %vm275_vm0, %v615_v4  ;;  %333 = vmatpush1.bf16.msra.mxu0 (!%p192_p3), %v580_v1  ;;  %v583_v5 = vld [vmem:[%s704_s1 + $0x10] ss:$8 sps:$4 sm:$0xff] (!%p192_p3)   ;;  %v584_v6 = vld [vmem:[%s704_s1 + $0x24] ss:$8 sps:$4 sm:$0xff] (!%p192_p3)   ;;  %v385_v14 = vshrl.u32 (!%p192_p3), %v384_v11, 7 }
   0x9   : > { %334 = vmatprep.subr.bf16.mxu0 (!%p192_p3), %v581_v3  ;;  %v586_v7 = vld [vmem:[%s704_s1 + $0x20] ss:$8 sps:$4 sm:$0xff] (!%p192_p3)   ;;  %v587_v8 = vld [vmem:[%s704_s1 + $0x34] ss:$8 sps:$4 sm:$0xff] (!%p192_p3)   ;;  %v589_v9 = vld [vmem:[%s704_s1 + $0x30] ss:$8 sps:$4 sm:$0xff] (!%p192_p3)  }
   0xa   : > { %v386_v19 = vsub.s32 (!%p192_p3), 0, %v385_v14  ;;  %v390_v20 = vsub.s32 (!%p192_p3), 1, %v385_v14  ;;  %v382_v21 = vld [vmem:[%s705_s2] sm:$0x3] (!%p192_p3)  ;;  %vm405_vm2 = vcmask (!%p192_p3), 523268  }
   0xb   : > { %vm406_vm3 = vmor (!%p192_p3), %vm405_vm2, %vm404_vm1 }
   0xc   : > { %335 = vmatpush1.bf16.msra.mxu0 (!%p192_p3), %v583_v5  ;;  %v387_v22 = vrot.slane (!%p192_p3), %v382_v21, %v386_v19  ;;  %v391_v23 = vrot.slane (!%p192_p3), %v382_v21, %v390_v20 }
   0xd   : > { %336 = vmatprep.subr.bf16.mxu0 (!%p192_p3), %v584_v6 }
   0xe   : > { %s712_s12 = smov (!%p235_p4, %s604_s12), 1 }
   0xf   : > { %s535_s30 = sshll.u32 %s712_s12, 2  ;;  %v278_v12 = vld [vmem:[#allocation2 + $0x8] sm:$0xff]  ;;  %s550_s11 = sshll.u32 %s712_s12, 3 }
  0x10   : > { %337 = vmatpush1.bf16.msra.mxu0 %v586_v7  ;;  %s241_s8 = scalar_lea.vmem %s703_s0, %s535_s30  ;;  %s267_s18 = scalar_lea.vmem %s706_s3, %s550_s11 }
  0x11   : > { %338 = vmatprep.subr.bf16.mxu0 %v587_v8  ;;  %v279_v10 = vld [vmem:[%s241_s8] sm:$0xf] }
  0x14   : > { %339 = vmatpush1.bf16.msra.mxu0 %v589_v9 }
  0x17   : > { %546 = vmatmul.mubr.msk.bf16.vlgmr.msra.gmra.mrb[0].mxu0 %vm275_vm0, %v279_v10 }
  0xea   : > { %v366_v13 = vpop.f32.mrb[0].mxu0 }
  0xeb   : > { %v368_v15 = vpop.f32.mrb[1].mxu0  ;;  %v394_v25 = vadd.f32 %v387_v22, %v366_v13 }
  0xec   : > { %v374_v16 = vadd.f32 %v368_v15, %v278_v12  ;;  %v370_v17 = vpop.f32.mrb[2].mxu0 }
  0xed   : > { %v371_v18 = vpop.f32.mrb[3].mxu0 }
  0xee   : > { %376 = vst.msk [vmem:[#allocation2 + $0x8] sm:$0xff] %vm275_vm0, %v374_v16 }
  0xf5   : > { %v381_v24 = vld [vmem:[#allocation2 + $0x8] sm:$0xff] }
  0xf6   : > { %v395_v26 = vadd.f32 %v391_v23, %v381_v24 }
  0xf8   : > { %v551_v27 = vpack.c.bf16 %v395_v26, %v394_v25 }
  0xfa   : > { %407 = vst.msk [vmem:[%s267_s18] sm:$0xff] %vm406_vm3, %v551_v27 }
  0xfb PF: > { %s13_s14 = sadd.s32 1, %s612_s14   ;;  %s707_s12 = smov %s608_s13 }
  0xfc   : > { %p10_p5 = scmp.ge.s32.totalorder %s13_s14, 4   ;;  %s708_s13 = smov %s710_s15 }
  0xfe   :  { %12 = sbr.rel (!%p10_p5) target bundleno = 2 (0x2), region = 76 }

// kernel: run.17
= control target key start
LH: loop header
LB: loop body
LE: loop exit
PB: predicated region body
PF: predicated region fallthrough
CT: control target
= control target key end

     0   :  { %s908_s12 = smov 0   ;;  %s1003_s0 = inlined_call_operand.vmem [shape: bf16[2,8,64], index: 0, kind: input, shape index: {}]   ;;  %s1004_s1 = inlined_call_operand.vmem [shape: bf16[2,8,64], index: 1, kind: input, shape index: {}]   ;;  %s1005_s2 = inlined_call_operand.vmem [shape: bf16[2,8,64], index: 2, kind: input, shape index: {}]   ;;  %s1006_s3 = inlined_call_operand.vmem [shape: bf16[2,8,64], index: 3, kind: output, shape index: {}]  }
   0x1 LB: > { %s751_s13 = sadd.s32 4294967295, %s878_s12   ;;  %p755_p0 = scmp.ge.s32.totalorder %s878_s12, 1  ;;  %s878_s12 = sphi %s908_s12, %s13_s12  }
   0x2   : > { %p154_p1 = scmp.lt.s32.totalorder %s878_s12, 3 }
   0x4   : > { %p155_p2 = pnand %p755_p0, %p154_p1 }
   0x5   : > { %p184_p3 = scmp.lt.s32.totalorder (!%p155_p2), %s751_s13, 1  ;;  %v880_v0 = vmov (!%p155_p2), 0.0   ;;  %vm881_vm0 = vmmov (!%p155_p2), 0   ;;  %vm204_vm1 = vcmask (!%p155_p2), 130048   ;;  %vm252_vm2 = vcmask (!%p155_p2), 64512   ;;  %s882_s21 = smov (!%p155_p2), 112  }
   0x6   : > { %158 = sbr.rel (%p155_p2) target bundleno = 1477 (0x5c5), region = 32  ;;  %789 = vmatprep.subr.bf16.mxu0 (!%p155_p2), %v880_v0  ;;  %791 = vmatprep.mubr.msk.bf16.mxu0 (!%p155_p2), %vm881_vm0, %v880_v0  ;;  %s883_s22 = smov (!%p155_p2), 96   ;;  %vm268_vm3 = vcmask (!%p155_p2), 1043456   ;;  %vm667_vm4 = vcmask (!%p155_p2), 261120   ;;  %vm669_vm5 = vcmask (!%p155_p2), 392192   ;;  %vm672_vm6 = vcmask (!%p155_p2), 519168  }
   0x7   : > { %795 = vmatprep.subr.bf16.mxu1 (!%p155_p2), %v880_v0  ;;  %797 = vmatprep.mubr.msk.bf16.mxu1 (!%p155_p2), %vm881_vm0, %v880_v0  ;;  %s884_s23 = smov (!%p155_p2), 80   ;;  %s885_s27 = smov (!%p155_p2), 16  }
   0x8   : > { %s886_s28 = smov (!%p155_p2), 32   ;;  %s887_s29 = smov (!%p155_p2), 48  }
   0xd   : > { %s1008_s13 = smov (!%p184_p3, %s751_s13), 1 }
   0xe   : > { %s922_s14 = sshll.u32 %s1008_s13, 2 }
   0xf   : > { %s191_s17 = scalar_lea.vmem %s1004_s1, %s922_s14  ;;  %s187_s20 = scalar_lea.vmem %s1003_s0, %s922_s14 }
  0x10   : > { %v202_v1 = vld [vmem:[%s191_s17] sm:$0xf]  ;;  %s195_s26 = scalar_lea.vmem %s1005_s2, %s922_s14  ;;  %s199_s5 = scalar_lea.vmem %s1006_s3, %s922_s14 }
  0x11   : > { %v209_v2 = vsel %vm204_vm1, %v202_v1, 0  ;;  %v201_v3 = vld [vmem:[%s187_s20] sm:$0xf]  ;;  %v763_v10 = vcombine.low %v202_v1, %v202_v1 }
  0x12   : > { %790 = vmatpush3.bf16.xpose.msra.mxu0 %v209_v2  ;;  %v762_v11 = vcombine.low %v201_v3, %v201_v3  ;;  %v948_v17 = vld [vmem:[%s195_s26] sm:$0xf] }
  0x13   : > { %807 = vmatprep.subr.bf16.mxu0 %v880_v0  ;;  %320 = vrot.lane.b32.xlu1 %v763_v10, %s882_s21  ;;  %v270_v18 = vsel %vm268_vm3, %v948_v17, 0  ;;  %v765_v1 = vcombine.low %v948_v17, %v948_v17 }
  0x14   : > { %796 = vmatpush3.bf16.msra.mxu1 %v270_v18 }
  0x15   : > { %801 = vmatprep.subr.bf16.mxu1 %v880_v0 }
  0x17   : > { %315 = vrot.lane.b32.xlu1 %v762_v11, %s882_s21 }
  0x19   : > { %792 = vmatmul.mubr.msk.bf16.vlgmr.msra.gmra.mrb[0].mxu0 %vm204_vm1, %v201_v3 }
  0x1a   : > { %809 = vmatprep.mubr.msk.bf16.mxu0 %vm881_vm0, %v880_v0 }
  0x1b   : > { %432 = vrot.lane.b32.xlu1 %v762_v11, %s883_s22 }
  0x1f   : > { %545 = vrot.lane.b32.xlu1 %v763_v10, %s884_s23 }
  0x23   : > { %543 = vrot.lane.b32.xlu1 %v762_v11, %s884_s23 }
  0x85   : > { %v321_v21 = vpop.permute.xlu1 %320 }
  0x86   : > { %v326_v23 = vsel %vm204_vm1, %v321_v21, 0 }
  0x89   : > { %v316_v25 = vpop.permute.xlu1 %315 }
  0x8d   : > { %v433_v27 = vpop.permute.xlu1 %432 }
  0x91   : > { %v546_v29 = vpop.permute.xlu1 %545 }
  0x92   : > { %v551_v30 = vsel %vm204_vm1, %v546_v29, 0 }
  0x95   : > { %v544_v31 = vpop.permute.xlu1 %543 }
  0xec   : > { %v245_v4 = vpop.f32.mrb[0].mxu0 }
  0xed   : > { %v251_v5 = vmul.f32 0.25, %v245_v4  ;;  %v793_v6 = vpop.f32.mrb[1].mxu0 }
  0xee   : > { %v248_v7 = vpop.f32.mrb[2].mxu0 }
  0xef   : > { %v794_v8 = vpop.f32.mrb[3].mxu0  ;;  %v253_v9 = vsel %vm252_vm2, %v251_v5, -inf }
  0xf0   : > { %254 = vmax.xlane.f32.xlu0 %v253_v9 }
 0x17d   : > { %v255_v12 = vpop.xlane.xlu0 %254 }
 0x17e   : > { %v256_v13 = vsub.f32 %v251_v5, %v255_v12 }
 0x180   : > { %v257_v14 = vmul.f32 1.442695, %v256_v13 }
 0x182   : > { %856 = vpow2.f32 %v257_v14 }
 0x18c   : > { %v857_v15 = vpop.eup %856 }
 0x18d   : > { %v259_v16 = vsel %vm252_vm2, %v857_v15, 0.0 }
 0x18e   : > { %260 = vadd.xlane.f32.xlu0 %v259_v16 }
 0x1a4   : > { %434 = vrot.lane.b32.xlu0 %v763_v10, %s883_s22 }
 0x21b   : > { %v261_v19 = vpop.xlane.xlu0 %260 }
 0x21c   : > { %858 = vrcp.f32 %v261_v19 }
 0x21f   : > { %v435_v26 = vpop.permute.xlu0 %434 }
 0x220   : > { %v440_v28 = vsel %vm204_vm1, %v435_v26, 0 }
 0x226   : > { %v859_v20 = vpop.eup %858 }
 0x227   : > { %v263_v22 = vmul.f32 %v859_v20, %v857_v15 }
 0x229   : > { %v264_v24 = vpack.c.bf16 %v263_v22, %v263_v22 }
 0x22b   : > { %798 = vmatmul.mubr.msk.bf16.vlgmr.msra.gmra.mrb[0].mxu1 %vm252_vm2, %v264_v24 }
 0x22c   : > { %802 = vmatpush3.bf16.xpose.msra.mxu1 %v326_v23  ;;  %803 = vmatprep.mubr.msk.bf16.mxu1 %vm881_vm0, %v880_v0 }
 0x22d   : > { %813 = vmatprep.subr.bf16.mxu1 %v880_v0 }
 0x233   : > { %804 = vmatmul.mubr.msk.bf16.vlgmr.msra.gmra.mrb[4].mxu1 %vm204_vm1, %v316_v25 }
 0x234   : > { %814 = vmatpush3.bf16.xpose.msra.mxu1 %v440_v28  ;;  %815 = vmatprep.mubr.msk.bf16.mxu1 %vm881_vm0, %v880_v0 }
 0x235   : > { %825 = vmatprep.subr.bf16.mxu1 %v880_v0 }
 0x23b   : > { %816 = vmatmul.mubr.msk.bf16.vlgmr.msra.gmra.mrb[8].mxu1 %vm204_vm1, %v433_v27 }
 0x23c   : > { %826 = vmatpush3.bf16.xpose.msra.mxu1 %v551_v30  ;;  %827 = vmatprep.mubr.msk.bf16.mxu1 %vm881_vm0, %v880_v0 }
 0x243   : > { %828 = vmatmul.mubr.msk.bf16.vlgmr.msra.gmra.mrb[12].mxu1 %vm204_vm1, %v544_v31 }
 0x2fe   : > { %v969_v32 = vpop.f32.mrb[0].mxu1 }
 0x2ff   : > { %v799_v33 = vpop.f32.mrb[1].mxu1 }
 0x300   : > { %v309_v34 = vpop.f32.mrb[2].mxu1 }
 0x301   : > { %v800_v35 = vpop.f32.mrb[3].mxu1 }
 0x306   : > { %v362_v36 = vpop.f32.mrb[4].mxu1 }
 0x307   : > { %v368_v37 = vmul.f32 0.25, %v362_v36  ;;  %v805_v38 = vpop.f32.mrb[5].mxu1 }
 0x308   : > { %v365_v39 = vpop.f32.mrb[6].mxu1 }
 0x309   : > { %v806_v40 = vpop.f32.mrb[7].mxu1  ;;  %v369_v41 = vsel %vm252_vm2, %v368_v37, -inf }
 0x30a   : > { %370 = vmax.xlane.f32.xlu1 %v369_v41 }
 0x30e   : > { %v476_v42 = vpop.f32.mrb[8].mxu1 }
 0x30f   : > { %v482_v43 = vmul.f32 0.25, %v476_v42  ;;  %v817_v44 = vpop.f32.mrb[9].mxu1 }
 0x310   : > { %v479_v45 = vpop.f32.mrb[10].mxu1 }
 0x311   : > { %v483_v46 = vsel %vm252_vm2, %v482_v43, -inf  ;;  %v818_v47 = vpop.f32.mrb[11].mxu1 }
 0x312   : > { %484 = vmax.xlane.f32.xlu0 %v483_v46 }
 0x316   : > { %v587_v48 = vpop.f32.mrb[12].mxu1 }
 0x317   : > { %v593_v49 = vmul.f32 0.25, %v587_v48  ;;  %v829_v50 = vpop.f32.mrb[13].mxu1 }
 0x318   : > { %v590_v51 = vpop.f32.mrb[14].mxu1 }
 0x319   : > { %v594_v52 = vsel %vm252_vm2, %v593_v49, -inf  ;;  %v830_v53 = vpop.f32.mrb[15].mxu1 }
 0x31a   : > { %595 = vmax.xlane.f32.xlu1 %v594_v52 }
 0x397   : > { %v371_v54 = vpop.xlane.xlu1 %370 }
 0x398   : > { %v372_v55 = vsub.f32 %v368_v37, %v371_v54 }
 0x39a   : > { %v373_v56 = vmul.f32 1.442695, %v372_v55 }
 0x39c   : > { %860 = vpow2.f32 %v373_v56 }
 0x39f   : > { %v485_v57 = vpop.xlane.xlu0 %484 }
 0x3a0   : > { %v486_v58 = vsub.f32 %v482_v43, %v485_v57 }
 0x3a2   : > { %v487_v59 = vmul.f32 1.442695, %v486_v58 }
 0x3a4   : > { %862 = vpow2.f32 %v487_v59 }
 0x3a6   : > { %v861_v60 = vpop.eup %860 }
 0x3a7   : > { %v375_v61 = vsel %vm252_vm2, %v861_v60, 0.0  ;;  %v596_v2 = vpop.xlane.xlu1 %595 }
 0x3a8   : > { %376 = vadd.xlane.f32.xlu1 %v375_v61  ;;  %v597_v3 = vsub.f32 %v593_v49, %v596_v2 }
 0x3aa   : > { %v598_v4 = vmul.f32 1.442695, %v597_v3 }
 0x3ac   : > { %864 = vpow2.f32 %v598_v4 }
 0x3ae   : > { %v863_v62 = vpop.eup %862 }
 0x3af   : > { %v489_v63 = vsel %vm252_vm2, %v863_v62, 0.0 }
 0x3b0   : > { %490 = vadd.xlane.f32.xlu0 %v489_v63 }
 0x3b6   : > { %v865_v5 = vpop.eup %864 }
 0x3b7   : > { %v600_v6 = vsel %vm252_vm2, %v865_v5, 0.0 }
 0x3b9   : > { %495 = vrot.lane.b32.xlu1 %v765_v1, %s883_s22 }
 0x3c6   : > { %384 = vrot.lane.b32.xlu0 %v765_v1, %s882_s21 }
 0x3dd   : > { %601 = vadd.xlane.f32.xlu1 %v600_v6 }
 0x3ee   : > { %606 = vrot.lane.b32.xlu1 %v765_v1, %s884_s23 }
 0x435   : > { %v377_v7 = vpop.xlane.xlu1 %376 }
 0x436   : > { %866 = vrcp.f32 %v377_v7 }
 0x439   : > { %v496_v13 = vpop.permute.xlu1 %495 }
 0x43a   : > { %v501_v15 = vsel %vm268_vm3, %v496_v13, 0 }
 0x43d   : > { %v491_v8 = vpop.xlane.xlu0 %490 }
 0x43e   : > { %868 = vrcp.f32 %v491_v8 }
 0x440   : > { %v867_v9 = vpop.eup %866 }
 0x441   : > { %v379_v10 = vmul.f32 %v867_v9, %v861_v60  ;;  %v385_v11 = vpop.permute.xlu0 %384 }
 0x442   : > { %v390_v12 = vsel %vm268_vm3, %v385_v11, 0 }
 0x443   : > { %808 = vmatpush3.bf16.msra.mxu0 %v390_v12  ;;  %v380_v14 = vpack.c.bf16 %v379_v10, %v379_v10 }
 0x444   : > { %819 = vmatprep.subr.bf16.mxu0 %v880_v0 }
 0x446   : > { %810 = vmatmul.mubr.msk.bf16.vlgmr.msra.gmra.mrb[4].mxu0 %vm252_vm2, %v380_v14 }
 0x447   : > { %820 = vmatpush3.bf16.msra.mxu0 %v501_v15  ;;  %821 = vmatprep.mubr.msk.bf16.mxu0 %vm881_vm0, %v880_v0 }
 0x448   : > { %v869_v16 = vpop.eup %868  ;;  %831 = vmatprep.subr.bf16.mxu0 %v880_v0 }
 0x449   : > { %v493_v17 = vmul.f32 %v869_v16, %v863_v62 }
 0x44b   : > { %v494_v18 = vpack.c.bf16 %v493_v17, %v493_v17 }
 0x44e   : > { %822 = vmatmul.mubr.msk.bf16.vlgmr.msra.gmra.mrb[8].mxu0 %vm252_vm2, %v494_v18 }
 0x44f   : > { %833 = vmatprep.mubr.msk.bf16.mxu0 %vm881_vm0, %v880_v0 }
 0x46a   : > { %v602_v19 = vpop.xlane.xlu1 %601 }
 0x46b   : > { %870 = vrcp.f32 %v602_v19 }
 0x46e   : > { %v607_v20 = vpop.permute.xlu1 %606 }
 0x46f   : > { %v612_v21 = vsel %vm268_vm3, %v607_v20, 0 }
 0x470   : > { %832 = vmatpush3.bf16.msra.mxu0 %v612_v21 }
 0x475   : > { %v871_v22 = vpop.eup %870 }
 0x476   : > { %v604_v23 = vmul.f32 %v871_v22, %v865_v5 }
 0x478   : > { %v605_v24 = vpack.c.bf16 %v604_v23, %v604_v23 }
 0x47a   : > { %834 = vmatmul.mubr.msk.bf16.vlgmr.msra.gmra.mrb[12].mxu0 %vm252_vm2, %v605_v24 }
 0x519   : > { %v426_v25 = vpop.f32.mrb[4].mxu0 }
 0x51a   : > { %655 = vrot.lane.b32.xlu0 %v426_v25, %s885_s27  ;;  %v811_v26 = vpop.f32.mrb[5].mxu0 }
 0x51b   : > { %v429_v27 = vpop.f32.mrb[6].mxu0 }
 0x51c   : > { %v812_v28 = vpop.f32.mrb[7].mxu0 }
 0x521   : > { %v537_v29 = vpop.f32.mrb[8].mxu0 }
 0x522   : > { %659 = vrot.lane.b32.xlu1 %v537_v29, %s886_s28  ;;  %v823_v0 = vpop.f32.mrb[9].mxu0 }
 0x523   : > { %v540_v30 = vpop.f32.mrb[10].mxu0 }
 0x524   : > { %v824_v31 = vpop.f32.mrb[11].mxu0 }
 0x54d   : > { %v648_v33 = vpop.f32.mrb[12].mxu0 }
 0x54e   : > { %663 = vrot.lane.b32.xlu0 %v648_v33, %s887_s29  ;;  %v835_v34 = vpop.f32.mrb[13].mxu0 }
 0x54f   : > { %v651_v35 = vpop.f32.mrb[14].mxu0 }
 0x550   : > { %v836_v36 = vpop.f32.mrb[15].mxu0 }
 0x58c   : > { %v656_v37 = vpop.permute.xlu0 %655 }
 0x58d   : > { %v666_v39 = vsel %vm204_vm1, %v969_v32, %v656_v37 }
 0x594   : > { %v660_v38 = vpop.permute.xlu1 %659 }
 0x595   : > { %v668_v40 = vsel %vm667_vm4, %v666_v39, %v660_v38 }
 0x5c0   : > { %v664_v41 = vpop.permute.xlu0 %663 }
 0x5c1   : > { %v670_v42 = vsel %vm669_vm5, %v668_v40, %v664_v41 }
 0x5c2   : > { %v671_v43 = vpack.c.bf16 %v670_v42, %v670_v42 }
 0x5c4   : > { %673 = vst.msk [vmem:[%s199_s5] sm:$0xf] %vm672_vm6, %v671_v43 }
 0x5c5 PF: > { %s13_s12 = sadd.s32 1, %s878_s12  }
 0x5c6   : > { %p10_p4 = scmp.ge.s32.totalorder %s13_s12, 4  }
 0x5c8   :  { %12 = sbr.rel (!%p10_p4) target bundleno = 1 (0x1), region = 68 }

// kernel: run.18
= control target key start
LH: loop header
LB: loop body
LE: loop exit
PB: predicated region body
PF: predicated region fallthrough
CT: control target
= control target key end

     0   :  { %s665_s21 = smov 0   ;;  %s667_s22 = smov 0   ;;  %s732_s0 = inlined_call_operand.vmem [shape: bf16[16,64], index: 0, kind: input, shape index: {}]   ;;  %s733_s1 = inlined_call_operand.vmem [shape: bf16[64,64], index: 1, kind: input, shape index: {}]   ;;  %s734_s2 = inlined_call_operand.vmem [shape: f32[1,64], index: 2, kind: input, shape index: {}, may-alias: {2,5}]   ;;  %s735_s3 = inlined_call_operand.vmem [shape: bf16[16,64], index: 3, kind: input, shape index: {}]   ;;  %s736_s4 = inlined_call_operand.vmem [shape: f32[1,64], index: 4, kind: input, shape index: {}]   ;;  %s737_s5 = inlined_call_operand.vmem [shape: f32[1,64], index: 5, kind: input, shape index: {}, may-alias: {2,5}]   ;;  %s738_s6 = inlined_call_operand.vmem [shape: bf16[16,64], index: 6, kind: output, shape index: {}]  }
   0x1   :  { %s669_s23 = smov 0  }
   0x2 LB: > { %s28_s24 = sadd.s32 1, %s622_s22  ;;  %p541_p0 = scmp.ge.s32.totalorder %s626_s23, 1  ;;  %s626_s23 = sphi %s669_s23, %s16_s23   ;;  %s622_s22 = sphi %s667_s22, %s740_s22   ;;  %s618_s21 = sphi %s665_s21, %s739_s21  }
   0x3   : > { %p30_p1 = scmp.ge.s32.totalorder %s28_s24, 2  ;;  %p248_p2 = scmp.lt.s32.totalorder %s626_s23, 3 }
   0x5   : > { %s742_s24 = smov (%p30_p1, %s28_s24), 0  ;;  %p249_p3 = pnand %p541_p0, %p248_p2 }
   0x6   : > { %v598_v0 = vld [vmem:[%s733_s1] sm:$0xff] (!%p249_p3)   ;;  %v628_v1 = vmov (!%p249_p3), 0.0   ;;  %v599_v2 = vld [vmem:[%s733_s1 + $0x8] sm:$0xff] (!%p249_p3)   ;;  %vm629_vm0 = vmmov (!%p249_p3), 0   ;;  %p288_p4 = scmp.lt.s32.totalorder (!%p249_p3), %s618_s21, 1  ;;  %vm314_vm1 = vcmask (!%p249_p3), 523264  }
   0x7   : > { %252 = sbr.rel (%p249_p3) target bundleno = 565 (0x235), region = 44  ;;  %560 = vmatprep.subr.bf16.mxu0 (!%p249_p3), %v628_v1  ;;  %568 = vmatprep.mubr.msk.bf16.mxu0 (!%p249_p3), %vm629_vm0, %v628_v1  ;;  %315 = vst.msk [vmem:[#allocation2] sm:$0xff] (!%p249_p3), %vm314_vm1, %v628_v1  ;;  %v600_v3 = vld [vmem:[%s733_s1 + $0x10] sm:$0xff] (!%p249_p3)   ;;  %v601_v4 = vld [vmem:[%s733_s1 + $0x18] sm:$0xff] (!%p249_p3)   ;;  %v550_v13 = vld [vmem:[%s734_s2] ss:$0 sm:$0xff] (!%p249_p3) }
   0x8   : > { %561 = vmatpush3.bf16.msra.mxu0 (!%p249_p3), %v598_v0  ;;  %v551_v28 = vld [vmem:[%s736_s4] ss:$0 sm:$0xff] (!%p249_p3)  ;;  %vm442_vm2 = vcmask (!%p249_p3), 519168  }
   0x9   : > { %562 = vmatprep.subr.bf16.mxu0 (!%p249_p3), %v628_v1  ;;  %v552_v30 = vld [vmem:[%s737_s5] ss:$0 sm:$0xff] (!%p249_p3) }
   0xc   : > { %563 = vmatpush3.bf16.msra.mxu0 (!%p249_p3), %v599_v2 }
   0xd   : > { %564 = vmatprep.subr.bf16.mxu0 (!%p249_p3), %v628_v1 }
   0xe   : > { %s744_s21 = smov (!%p288_p4, %s618_s21), 1  ;;  %v316_v6 = vld [vmem:[#allocation2] sm:$0xff] }
   0xf   : > { %s693_s7 = sshll.u32 %s744_s21, 2 }
  0x10   : > { %565 = vmatpush3.bf16.msra.mxu0 %v600_v3  ;;  %s294_s12 = scalar_lea.vmem %s732_s0, %s693_s7  ;;  %s304_s15 = scalar_lea.vmem %s735_s3, %s693_s7 }
  0x11   : > { %566 = vmatprep.subr.bf16.mxu0 %v628_v1  ;;  %v317_v5 = vld [vmem:[%s294_s12] sm:$0xf]  ;;  %s308_s27 = scalar_lea.vmem %s738_s6, %s693_s7 }
  0x12   : > { %v408_v12 = vld [vmem:[%s304_s15] sm:$0xf] }
  0x13   : > { %v409_v14 = vunpack.c.l.bf16 %v408_v12 }
  0x14   : > { %567 = vmatpush3.bf16.msra.mxu0 %v601_v4 }
  0x17   : > { %569 = vmatmul.mubr.msk.bf16.vlgmr.msra.gmra.mrb[0].mxu0 %vm314_vm1, %v317_v5 }
  0xea   : > { %v388_v7 = vpop.f32.mrb[0].mxu0 }
  0xeb   : > { %v394_v8 = vadd.f32 %v388_v7, %v316_v6  ;;  %v570_v9 = vpop.f32.mrb[1].mxu0 }
  0xec   : > { %v391_v10 = vpop.f32.mrb[2].mxu0 }
  0xed   : > { %395 = vst.msk [vmem:[#allocation2] sm:$0xff] %vm314_vm1, %v394_v8  ;;  %v571_v11 = vpop.f32.mrb[3].mxu0 }
  0xf4   : > { %v399_v15 = vld [vmem:[#allocation2] sm:$0xff] }
  0xf5   : > { %v407_v16 = vadd.f32 %v550_v13, %v399_v15 }
  0xf7   : > { %v410_v17 = vadd.f32 %v409_v14, %v407_v16 }
  0xf9   : > { %v411_v18 = vsel %vm314_vm1, %v410_v17, 0.0 }
  0xfa   : > { %412 = vadd.xlane.f32.xlu0 %v411_v18 }
 0x187   : > { %v413_v19 = vpop.xlane.xlu0 %412 }
 0x188   : > { %v415_v20 = vmul.f32 0.015625, %v413_v19 }
 0x18a   : > { %v416_v21 = vsub.f32 %v410_v17, %v415_v20 }
 0x18c   : > { %v417_v22 = vmul.f32 %v416_v21, %v416_v21 }
 0x18e   : > { %v418_v23 = vsel %vm314_vm1, %v417_v22, 0.0 }
 0x18f   : > { %419 = vadd.xlane.f32.xlu0 %v418_v23 }
 0x21c   : > { %v420_v24 = vpop.xlane.xlu0 %419 }
 0x21d   : > { %v421_v25 = vmul.f32 0.015625, %v420_v24 }
 0x21f   : > { %v422_v26 = vadd.f32 1e-05, %v421_v25 }
 0x221   : > { %602 = vrsqrt.f32 %v422_v26 }
 0x22b   : > { %v603_v27 = vpop.eup %602 }
 0x22c   : > { %v424_v29 = vmul.f32 %v603_v27, %v416_v21 }
 0x22e   : > { %v432_v31 = vmul.f32 %v551_v28, %v424_v29 }
 0x230   : > { %v440_v32 = vadd.f32 %v552_v30, %v432_v31 }
 0x232   : > { %v441_v33 = vpack.c.bf16 %v440_v32, %v440_v32 }
 0x234   : > { %443 = vst.msk [vmem:[%s308_s27] sm:$0xf] %vm442_vm2, %v441_v33 }
 0x235 PF: > { %s16_s23 = sadd.s32 1, %s626_s23   ;;  %s739_s21 = smov %s622_s22 }
 0x236   : > { %p13_p5 = scmp.ge.s32.totalorder %s16_s23, 4   ;;  %s740_s22 = smov %s742_s24 }
 0x238   :  { %15 = sbr.rel (!%p13_p5) target bundleno = 2 (0x2), region = 88 }

// kernel: run.19
= control target key start
LH: loop header
LB: loop body
LE: loop exit
PB: predicated region body
PF: predicated region fallthrough
CT: control target
= control target key end

     0   :  { %s571_s12 = smov 0   ;;  %s573_s13 = smov 0   ;;  %s622_s0 = inlined_call_operand.vmem [shape: bf16[16,64], index: 0, kind: input, shape index: {}]   ;;  %s623_s1 = inlined_call_operand.vmem [shape: bf16[64,64], index: 1, kind: input, shape index: {}]   ;;  %s624_s2 = inlined_call_operand.vmem [shape: f32[1,64], index: 2, kind: input, shape index: {}]   ;;  %s625_s3 = inlined_call_operand.vmem [shape: bf16[16,64], index: 3, kind: output, shape index: {}]  }
   0x1   :  { %s575_s14 = smov 0  }
   0x2 LB: > { %s32_s15 = sadd.s32 1, %s543_s13  ;;  %p467_p0 = scmp.ge.s32.totalorder %s547_s14, 1  ;;  %s547_s14 = sphi %s575_s14, %s13_s14   ;;  %s543_s13 = sphi %s573_s13, %s627_s13   ;;  %s539_s12 = sphi %s571_s12, %s626_s12  }
   0x3   : > { %p34_p1 = scmp.ge.s32.totalorder %s32_s15, 2  ;;  %p186_p2 = scmp.lt.s32.totalorder %s547_s14, 3 }
   0x5   : > { %s629_s15 = smov (%p34_p1, %s32_s15), 0  ;;  %p187_p3 = pnand %p467_p0, %p186_p2 }
   0x6   : > { %v521_v0 = vld [vmem:[%s623_s1] sm:$0xff] (!%p187_p3)   ;;  %v549_v1 = vmov (!%p187_p3), 0.0   ;;  %v522_v2 = vld [vmem:[%s623_s1 + $0x8] sm:$0xff] (!%p187_p3)   ;;  %vm550_vm0 = vmmov (!%p187_p3), 0   ;;  %p225_p4 = scmp.lt.s32.totalorder (!%p187_p3), %s539_s12, 1  ;;  %vm256_vm1 = vcmask (!%p187_p3), 523264  }
   0x7   : > { %190 = sbr.rel (%p187_p3) target bundleno = 250 (0xfa), region = 32  ;;  %483 = vmatprep.subr.bf16.mxu0 (!%p187_p3), %v549_v1  ;;  %491 = vmatprep.mubr.msk.bf16.mxu0 (!%p187_p3), %vm550_vm0, %v549_v1  ;;  %257 = vst.msk [vmem:[#allocation2] sm:$0xff] (!%p187_p3), %vm256_vm1, %v549_v1  ;;  %v523_v3 = vld [vmem:[%s623_s1 + $0x10] sm:$0xff] (!%p187_p3)   ;;  %v524_v4 = vld [vmem:[%s623_s1 + $0x18] sm:$0xff] (!%p187_p3)   ;;  %v475_v12 = vld [vmem:[%s624_s2] ss:$0 sm:$0xff] (!%p187_p3) }
   0x8   : > { %484 = vmatpush3.bf16.msra.mxu0 (!%p187_p3), %v521_v0  ;;  %vm351_vm2 = vcmask (!%p187_p3), 519168  }
   0x9   : > { %485 = vmatprep.subr.bf16.mxu0 (!%p187_p3), %v549_v1 }
   0xc   : > { %486 = vmatpush3.bf16.msra.mxu0 (!%p187_p3), %v522_v2 }
   0xd   : > { %487 = vmatprep.subr.bf16.mxu0 (!%p187_p3), %v549_v1 }
   0xe   : > { %s631_s12 = smov (!%p225_p4, %s539_s12), 1  ;;  %v258_v6 = vld [vmem:[#allocation2] sm:$0xff] }
   0xf   : > { %s468_s22 = sshll.u32 %s631_s12, 2 }
  0x10   : > { %488 = vmatpush3.bf16.msra.mxu0 %v523_v3  ;;  %s231_s27 = scalar_lea.vmem %s622_s0, %s468_s22  ;;  %s250_s5 = scalar_lea.vmem %s625_s3, %s468_s22 }
  0x11   : > { %489 = vmatprep.subr.bf16.mxu0 %v549_v1  ;;  %v259_v5 = vld [vmem:[%s231_s27] sm:$0xf] }
  0x14   : > { %490 = vmatpush3.bf16.msra.mxu0 %v524_v4 }
  0x17   : > { %492 = vmatmul.mubr.msk.bf16.vlgmr.msra.gmra.mrb[0].mxu0 %vm256_vm1, %v259_v5 }
  0xea   : > { %v330_v7 = vpop.f32.mrb[0].mxu0 }
  0xeb   : > { %v336_v8 = vadd.f32 %v330_v7, %v258_v6  ;;  %v493_v9 = vpop.f32.mrb[1].mxu0 }
  0xec   : > { %v333_v10 = vpop.f32.mrb[2].mxu0 }
  0xed   : > { %337 = vst.msk [vmem:[#allocation2] sm:$0xff] %vm256_vm1, %v336_v8  ;;  %v494_v11 = vpop.f32.mrb[3].mxu0 }
  0xf4   : > { %v341_v13 = vld [vmem:[#allocation2] sm:$0xff] }
  0xf5   : > { %v349_v14 = vadd.f32 %v475_v12, %v341_v13 }
  0xf7   : > { %v350_v15 = vpack.c.bf16 %v349_v14, %v349_v14 }
  0xf9   : > { %352 = vst.msk [vmem:[%s250_s5] sm:$0xf] %vm351_vm2, %v350_v15 }
  0xfa PF: > { %s13_s14 = sadd.s32 1, %s547_s14   ;;  %s626_s12 = smov %s543_s13 }
  0xfb   : > { %p10_p5 = scmp.ge.s32.totalorder %s13_s14, 4   ;;  %s627_s13 = smov %s629_s15 }
  0xfd   :  { %12 = sbr.rel (!%p10_p5) target bundleno = 2 (0x2), region = 76 }

// kernel: run.20
= control target key start
LH: loop header
LB: loop body
LE: loop exit
PB: predicated region body
PF: predicated region fallthrough
CT: control target
= control target key end

     0   :  { %s569_s12 = smov 0   ;;  %s571_s13 = smov 0   ;;  %s617_s0 = inlined_call_operand.vmem [shape: bf16[16,64], index: 0, kind: input, shape index: {}]   ;;  %s618_s1 = inlined_call_operand.vmem [shape: bf16[64,128], index: 1, kind: input, shape index: {}]   ;;  %s619_s2 = inlined_call_operand.vmem [shape: f32[1,128], index: 2, kind: input, shape index: {}]   ;;  %s620_s3 = inlined_call_operand.vmem [shape: bf16[16,128], index: 3, kind: output, shape index: {}]  }
   0x1   :  { %s573_s14 = smov 0  }
   0x2 LB: > { %s32_s15 = sadd.s32 1, %s541_s13  ;;  %p465_p0 = scmp.ge.s32.totalorder %s545_s14, 1  ;;  %s545_s14 = sphi %s573_s14, %s13_s14   ;;  %s541_s13 = sphi %s571_s13, %s622_s13   ;;  %s537_s12 = sphi %s569_s12, %s621_s12  }
   0x3   : > { %p34_p1 = scmp.ge.s32.totalorder %s32_s15, 2  ;;  %p186_p2 = scmp.lt.s32.totalorder %s545_s14, 3 }
   0x5   : > { %s624_s15 = smov (%p34_p1, %s32_s15), 0  ;;  %p187_p3 = pnand %p465_p0, %p186_p2 }
   0x6   : > { %v519_v0 = vld [vmem:[%s618_s1] sm:$0xff] (!%p187_p3)   ;;  %v547_v1 = vmov (!%p187_p3), 0.0   ;;  %v520_v2 = vld [vmem:[%s618_s1 + $0x8] sm:$0xff] (!%p187_p3)   ;;  %vm548_vm0 = vmmov (!%p187_p3), 0   ;;  %p225_p4 = scmp.lt.s32.totalorder (!%p187_p3), %s537_s12, 1  ;;  %v521_v3 = vld [vmem:[%s618_s1 + $0x10] sm:$0xff] (!%p187_p3)  }
   0x7   : > { %190 = sbr.rel (%p187_p3) target bundleno = 240 (0xf0), region = 32  ;;  %481 = vmatprep.subr.bf16.mxu0 (!%p187_p3), %v547_v1  ;;  %489 = vmatprep.mubr.msk.bf16.mxu0 (!%p187_p3), %vm548_vm0, %v547_v1  ;;  %v522_v4 = vld [vmem:[%s618_s1 + $0x18] sm:$0xff] (!%p187_p3)   ;;  %vm291_vm1 = vcmask (!%p187_p3), 523264   ;;  %v473_v6 = vld [vmem:[%s619_s2] ss:$0 sm:$0xff] (!%p187_p3) }
   0x8   : > { %482 = vmatpush3.bf16.msra.mxu0 (!%p187_p3), %v519_v0 }
   0x9   : > { %483 = vmatprep.subr.bf16.mxu0 (!%p187_p3), %v547_v1 }
   0xc   : > { %484 = vmatpush3.bf16.msra.mxu0 (!%p187_p3), %v520_v2 }
   0xd   : > { %485 = vmatprep.subr.bf16.mxu0 (!%p187_p3), %v547_v1 }
   0xe   : > { %s626_s12 = smov (!%p225_p4, %s537_s12), 1 }
   0xf   : > { %s466_s22 = sshll.u32 %s626_s12, 2 }
  0x10   : > { %486 = vmatpush3.bf16.msra.mxu0 %v521_v3  ;;  %s231_s27 = scalar_lea.vmem %s617_s0, %s466_s22  ;;  %s250_s5 = scalar_lea.vmem %s620_s3, %s466_s22 }
  0x11   : > { %487 = vmatprep.subr.bf16.mxu0 %v547_v1  ;;  %v258_v5 = vld [vmem:[%s231_s27] sm:$0xf] }
  0x14   : > { %488 = vmatpush3.bf16.msra.mxu0 %v522_v4 }
  0x17   : > { %490 = vmatmul.mubr.msk.bf16.vlgmr.msra.gmra.mrb[0].mxu0 %vm291_vm1, %v258_v5 }
  0xea   : > { %v329_v7 = vpop.f32.mrb[0].mxu0 }
  0xeb   : > { %v348_v8 = vadd.f32 %v473_v6, %v329_v7  ;;  %v491_v9 = vpop.f32.mrb[1].mxu0 }
  0xec   : > { %v332_v10 = vpop.f32.mrb[2].mxu0 }
  0xed   : > { %v349_v11 = vpack.c.bf16 %v348_v8, %v348_v8  ;;  %v492_v12 = vpop.f32.mrb[3].mxu0 }
  0xef   : > { %350 = vst [vmem:[%s250_s5] sm:$0xf] %v349_v11 }
  0xf0 PF: > { %s13_s14 = sadd.s32 1, %s545_s14   ;;  %s621_s12 = smov %s541_s13 }
  0xf1   : > { %p10_p5 = scmp.ge.s32.totalorder %s13_s14, 4   ;;  %s622_s13 = smov %s624_s15 }
  0xf3   :  { %12 = sbr.rel (!%p10_p5) target bundleno = 2 (0x2), region = 76 }

// kernel: run.15
= control target key start
LH: loop header
LB: loop body
LE: loop exit
PB: predicated region body
PF: predicated region fallthrough
CT: control target
= control target key end

     0   :  { %s872_s24 = smov 0   ;;  %s874_s25 = smov 0   ;;  %s969_s0 = inlined_call_operand.vmem [shape: bf16[16,64], index: 0, kind: input, shape index: {}]   ;;  %s970_s1 = inlined_call_operand.vmem [shape: bf16[64,128], index: 1, kind: input, shape index: {}]   ;;  %s971_s2 = inlined_call_operand.vmem [shape: f32[1,128], index: 2, kind: input, shape index: {}]   ;;  %s972_s3 = inlined_call_operand.vmem [shape: bf16[128,64], index: 3, kind: input, shape index: {}]   ;;  %s973_s4 = inlined_call_operand.vmem [shape: f32[1,64], index: 4, kind: input, shape index: {}, may-alias: {4,6}]   ;;  %s974_s5 = inlined_call_operand.vmem [shape: f32[1,64], index: 5, kind: input, shape index: {}]   ;;  %s975_s6 = inlined_call_operand.vmem [shape: f32[1,64], index: 6, kind: input, shape index: {}, may-alias: {4,6}]   ;;  %s976_s7 = inlined_call_operand.vmem [shape: bf16[16,64], index: 7, kind: output, shape index: {}]  }
   0x1   :  { %s876_s26 = smov 0  }
   0x2 LB: > { %s29_s27 = sadd.s32 1, %s824_s25  ;;  %p698_p0 = scmp.ge.s32.totalorder %s828_s26, 1  ;;  %s828_s26 = sphi %s876_s26, %s17_s26   ;;  %s824_s25 = sphi %s874_s25, %s978_s25   ;;  %s820_s24 = sphi %s872_s24, %s977_s24  }
   0x3   : > { %p31_p1 = scmp.ge.s32.totalorder %s29_s27, 2  ;;  %p276_p2 = scmp.lt.s32.totalorder %s828_s26, 3 }
   0x5   : > { %s980_s27 = smov (%p31_p1, %s29_s27), 0  ;;  %p277_p3 = pnand %p698_p0, %p276_p2 }
   0x6   : > { %v792_v0 = vld [vmem:[%s970_s1] sm:$0xff] (!%p277_p3)   ;;  %v830_v1 = vmov (!%p277_p3), 0.0   ;;  %v793_v2 = vld [vmem:[%s970_s1 + $0x8] sm:$0xff] (!%p277_p3)   ;;  %vm831_vm0 = vmmov (!%p277_p3), 0   ;;  %p318_p4 = scmp.lt.s32.totalorder (!%p277_p3), %s820_s24, 1  ;;  %vm344_vm1 = vcmask (!%p277_p3), 523264  }
   0x7   : > { %280 = sbr.rel (%p277_p3) target bundleno = 783 (0x30f), region = 48  ;;  %734 = vmatprep.subr.bf16.mxu0 (!%p277_p3), %v830_v1  ;;  %746 = vmatprep.subr.bf16.mxu1 (!%p277_p3), %v830_v1  ;;  %345 = vst.msk [vmem:[#allocation2] sm:$0xff] (!%p277_p3), %vm344_vm1, %v830_v1  ;;  %v796_v3 = vld [vmem:[%s972_s3] sm:$0xff] (!%p277_p3)   ;;  %v794_v4 = vld [vmem:[%s970_s1 + $0x10] sm:$0xff] (!%p277_p3)   ;;  %v797_v5 = vld [vmem:[%s972_s3 + $0x8] sm:$0xff] (!%p277_p3)   ;;  %vm585_vm2 = vcmask (!%p277_p3), 519168  }
   0x8   : > { %735 = vmatpush3.bf16.msra.mxu0 (!%p277_p3), %v792_v0  ;;  %742 = vmatprep.mubr.msk.bf16.mxu0 (!%p277_p3), %vm831_vm0, %v830_v1  ;;  %v795_v6 = vld [vmem:[%s970_s1 + $0x18] sm:$0xff] (!%p277_p3)   ;;  %v798_v7 = vld [vmem:[%s972_s3 + $0x10] sm:$0xff] (!%p277_p3)   ;;  %v800_v10 = vld [vmem:[%s972_s3 + $0x20] sm:$0xff] (!%p277_p3)  }
   0x9   : > { %736 = vmatprep.subr.bf16.mxu0 (!%p277_p3), %v830_v1  ;;  %762 = vmatprep.mubr.msk.bf16.mxu1 (!%p277_p3), %vm831_vm0, %v830_v1  ;;  %v799_v9 = vld [vmem:[%s972_s3 + $0x18] sm:$0xff] (!%p277_p3)   ;;  %v801_v11 = vld [vmem:[%s972_s3 + $0x28] sm:$0xff] (!%p277_p3)   ;;  %v802_v12 = vld [vmem:[%s972_s3 + $0x30] sm:$0xff] (!%p277_p3)  }
   0xa   : > { %747 = vmatpush3.bf16.msra.mxu1 (!%p277_p3), %v796_v3  ;;  %v803_v13 = vld [vmem:[%s972_s3 + $0x38] sm:$0xff] (!%p277_p3)   ;;  %v701_v14 = vld [vmem:[%s971_s2] ss:$0 sm:$0xff] (!%p277_p3) }
   0xb   : > { %748 = vmatprep.subr.bf16.mxu1 (!%p277_p3), %v830_v1  ;;  %v715_v29 = vld [vmem:[%s973_s4] ss:$0 sm:$0xff] (!%p277_p3) }
   0xc   : > { %737 = vmatpush3.bf16.msra.mxu0 (!%p277_p3), %v793_v2  ;;  %v716_v44 = vld [vmem:[%s974_s5] ss:$0 sm:$0xff] (!%p277_p3) }
   0xd   : > { %738 = vmatprep.subr.bf16.mxu0 (!%p277_p3), %v830_v1  ;;  %v717_v46 = vld [vmem:[%s975_s6] ss:$0 sm:$0xff] (!%p277_p3) }
   0xe   : > { %s982_s24 = smov (!%p318_p4, %s820_s24), 1  ;;  %749 = vmatpush3.bf16.msra.mxu1 %v797_v5  ;;  %v431_v22 = vld [vmem:[#allocation2] sm:$0xff] }
   0xf   : > { %s699_s15 = sshll.u32 %s982_s24, 2  ;;  %750 = vmatprep.subr.bf16.mxu1 %v830_v1 }
  0x10   : > { %739 = vmatpush3.bf16.msra.mxu0 %v794_v4  ;;  %s920_s22 = scalar_lea.vmem %s969_s0, %s699_s15  ;;  %s338_s29 = scalar_lea.vmem %s976_s7, %s699_s15 }
  0x11   : > { %740 = vmatprep.subr.bf16.mxu0 %v830_v1  ;;  %v346_v8 = vld [vmem:[%s920_s22] sm:$0xf] }
  0x12   : > { %751 = vmatpush3.bf16.msra.mxu1 %v798_v7  ;;  %v551_v28 = vld [vmem:[%s920_s22] sm:$0xf] }
  0x13   : > { %752 = vmatprep.subr.bf16.mxu1 %v830_v1  ;;  %v552_v30 = vunpack.c.l.bf16 %v551_v28 }
  0x14   : > { %741 = vmatpush3.bf16.msra.mxu0 %v795_v6 }
  0x16   : > { %753 = vmatpush3.bf16.msra.mxu1 %v799_v9 }
  0x17   : > { %743 = vmatmul.mubr.msk.bf16.vlgmr.msra.gmra.mrb[0].mxu0 %vm344_vm1, %v346_v8  ;;  %754 = vmatprep.subr.bf16.mxu1 %v830_v1 }
  0x1a   : > { %755 = vmatpush3.bf16.msra.mxu1 %v800_v10 }
  0x1b   : > { %756 = vmatprep.subr.bf16.mxu1 %v830_v1 }
  0x1e   : > { %757 = vmatpush3.bf16.msra.mxu1 %v801_v11 }
  0x1f   : > { %758 = vmatprep.subr.bf16.mxu1 %v830_v1 }
  0x22   : > { %759 = vmatpush3.bf16.msra.mxu1 %v802_v12 }
  0x23   : > { %760 = vmatprep.subr.bf16.mxu1 %v830_v1 }
  0x26   : > { %761 = vmatpush3.bf16.msra.mxu1 %v803_v13 }
  0xea   : > { %v424_v15 = vpop.f32.mrb[0].mxu0 }
  0xeb   : > { %v425_v16 = vadd.f32 %v701_v14, %v424_v15  ;;  %v744_v17 = vpop.f32.mrb[1].mxu0 }
  0xec   : > { %v427_v18 = vpop.f32.mrb[2].mxu0 }
  0xed   : > { %v430_v19 = vmax.f32 %v425_v16, 0.0  ;;  %v745_v20 = vpop.f32.mrb[3].mxu0 }
  0xef   : > { %v432_v21 = vpack.c.bf16 %v430_v19, %v430_v19 }
  0xf1   : > { %763 = vmatmul.mubr.bf16.vlgmr.msra.gmra.mrb[0].mxu1 %v432_v21 }
 0x1c4   : > { %v531_v23 = vpop.f32.mrb[0].mxu1 }
 0x1c5   : > { %v537_v24 = vadd.f32 %v531_v23, %v431_v22  ;;  %v764_v25 = vpop.f32.mrb[1].mxu1 }
 0x1c6   : > { %v534_v26 = vpop.f32.mrb[2].mxu1 }
 0x1c7   : > { %538 = vst.msk [vmem:[#allocation2] sm:$0xff] %vm344_vm1, %v537_v24  ;;  %v765_v27 = vpop.f32.mrb[3].mxu1 }
 0x1ce   : > { %v542_v31 = vld [vmem:[#allocation2] sm:$0xff] }
 0x1cf   : > { %v550_v32 = vadd.f32 %v715_v29, %v542_v31 }
 0x1d1   : > { %v553_v33 = vadd.f32 %v552_v30, %v550_v32 }
 0x1d3   : > { %v554_v34 = vsel %vm344_vm1, %v553_v33, 0.0 }
 0x1d4   : > { %555 = vadd.xlane.f32.xlu0 %v554_v34 }
 0x261   : > { %v556_v35 = vpop.xlane.xlu0 %555 }
 0x262   : > { %v558_v36 = vmul.f32 0.015625, %v556_v35 }
 0x264   : > { %v559_v37 = vsub.f32 %v553_v33, %v558_v36 }
 0x266   : > { %v560_v38 = vmul.f32 %v559_v37, %v559_v37 }
 0x268   : > { %v561_v39 = vsel %vm344_vm1, %v560_v38, 0.0 }
 0x269   : > { %562 = vadd.xlane.f32.xlu0 %v561_v39 }
 0x2f6   : > { %v563_v40 = vpop.xlane.xlu0 %562 }
 0x2f7   : > { %v564_v41 = vmul.f32 0.015625, %v563_v40 }
 0x2f9   : > { %v565_v42 = vadd.f32 1e-05, %v564_v41 }
 0x2fb   : > { %804 = vrsqrt.f32 %v565_v42 }
 0x305   : > { %v805_v43 = vpop.eup %804 }
 0x306   : > { %v567_v45 = vmul.f32 %v805_v43, %v559_v37 }
 0x308   : > { %v575_v47 = vmul.f32 %v716_v44, %v567_v45 }
 0x30a   : > { %v583_v48 = vadd.f32 %v717_v46, %v575_v47 }
 0x30c   : > { %v584_v49 = vpack.c.bf16 %v583_v48, %v583_v48 }
 0x30e   : > { %586 = vst.msk [vmem:[%s338_s29] sm:$0xf] %vm585_vm2, %v584_v49 }
 0x30f PF: > { %s17_s26 = sadd.s32 1, %s828_s26   ;;  %s977_s24 = smov %s824_s25 }
 0x310   : > { %p14_p5 = scmp.ge.s32.totalorder %s17_s26, 4   ;;  %s978_s25 = smov %s980_s27 }
 0x312   :  { %16 = sbr.rel (!%p14_p5) target bundleno = 2 (0x2), region = 95 }

</bundles_post_ra>
